<compile_context>
chip_gen: v7x
topology: tpu7x:2x2x1
jax: 0.10.0
libtpu: 0.0.40
codegen_flags: <defaults>
</compile_context>

<pallas_src>
import functools

import jax
import jax.numpy as jnp
from jax import lax
from jax.experimental import pallas as pl
from jax.experimental.pallas import tpu as pltpu


def _round_up(x, m):
    return (x + m - 1) // m * m


def _lstm_chunk_kernel(gx_ref, m_ref, whh_ref, inv_ref, out_ref,
                       h_sc, c_sc, acc_sc, *, t_chunk, h_pad, unroll):
    """One grid step == one chunk of `t_chunk` timesteps.

    gx_ref  : (t_chunk, Bp, 4*Hp) precomputed x @ W_ih^T + bias (f32)
    m_ref   : (t_chunk, Bp, 1)    mask chunk (f32)
    whh_ref : (Hp, 4*Hp)          hidden->gates weights (gate order i,f,o,g)
    inv_ref : (Bp, 1)             precomputed 1 / (sum_t mask + 0.001)
    out_ref : (Bp, Hp)            masked time-mean of h (written on last chunk)
    scratch : h / c / acc (Bp, Hp) f32 carries across chunks
    """
    ci = pl.program_id(0)
    nc = pl.num_programs(0)
    Hp = h_pad

    @pl.when(ci == 0)
    def _init():
        h_sc[...] = jnp.zeros_like(h_sc)
        c_sc[...] = jnp.zeros_like(c_sc)
        acc_sc[...] = jnp.zeros_like(acc_sc)

    # Loop-invariant weight load, hoisted once per chunk.
    whh = whh_ref[...]

    # ---- serial recurrence over the chunk (carries live in vregs) -----------
    def step(t, carry):
        h, c, acc = carry
        m_t = m_ref[t]                                            # (Bp, 1)
        gates = gx_ref[t] + jnp.dot(h.astype(whh.dtype), whh,
                                    preferred_element_type=jnp.float32)
        # gate order (i, f, o, g): one sigmoid over 3*Hp lanes, one tanh over Hp
        sig = jax.nn.sigmoid(gates[:, :3 * Hp])
        i_g = sig[:, 0 * Hp:1 * Hp]
        f_g = sig[:, 1 * Hp:2 * Hp]
        o_g = sig[:, 2 * Hp:3 * Hp]
        g_g = jnp.tanh(gates[:, 3 * Hp:])
        c = f_g * c + i_g * g_g
        h = o_g * jnp.tanh(c)
        acc = acc + h * m_t
        return h, c, acc

    carry0 = (h_sc[...], c_sc[...], acc_sc[...])
    h, c, acc = lax.fori_loop(0, t_chunk, step, carry0, unroll=unroll)
    h_sc[...] = h
    c_sc[...] = c
    acc_sc[...] = acc

    @pl.when(ci == nc - 1)
    def _finalize():
        out_ref[...] = acc_sc[...] * inv_ref[...]


def lstm_forward(x, mask, w_ih, w_hh, b_ih, b_hh, *,
                 t_chunk=32, matmul_dtype=jnp.bfloat16):
    """x: (T, B, E), mask: (T, B). Returns (B, H) f32.

    matmul_dtype: jnp.bfloat16 (default fast path; f32 accumulation, f32 cell
    math) or jnp.float32 (highest-precision path).
    """
    T, B, E = x.shape
    H = w_hh.shape[1]
    assert w_ih.shape == (4 * H, E)
    assert w_hh.shape == (4 * H, H)
    f32 = jnp.float32

    # ---- lane/sublane-aligned padded shapes ---------------------------------
    Bp = _round_up(B, 8)        # f32 sublane
    Hp = _round_up(H, 128)      # lane
    t_chunk = max(1, min(t_chunk, T))   # leading block dim: no 8-alignment needed
    Tp = _round_up(T, t_chunk)
    n_chunks = Tp // t_chunk
    unroll = max(1, min(8, t_chunk))    # partial unroll bounds vreg pressure

    # ---- weight prep: reorder gates (i,f,g,o) -> (i,f,o,g), pad H, transpose -
    perm = jnp.array([0, 1, 3, 2])

    def prep_w(w, k_dim, k_pad):
        # w: (4H, K) -> (K_pad, 4*Hp) with gate g in columns [g*Hp, g*Hp+H)
        w4 = jnp.asarray(w, f32).reshape(4, H, k_dim)[perm]
        w4 = jnp.pad(w4, ((0, 0), (0, Hp - H), (0, k_pad - k_dim)))
        return jnp.transpose(w4, (2, 0, 1)).reshape(k_pad, 4 * Hp)

    whh_p = prep_w(w_hh, H, Hp).astype(matmul_dtype)        # (Hp, 4*Hp)
    wih_p = prep_w(w_ih, E, E)                              # (E, 4*Hp), no K pad
    b4 = (jnp.asarray(b_ih, f32) + jnp.asarray(b_hh, f32)).reshape(4, H)[perm]
    bias_p = jnp.pad(b4, ((0, 0), (0, Hp - H))).reshape(1, 4 * Hp)

    # ---- hoisted input projection: one fully-parallel XLA matmul -------------
    proj_prec = (lax.Precision.HIGHEST if matmul_dtype == jnp.float32
                 else lax.Precision.DEFAULT)
    x2d = jnp.asarray(x, f32).reshape(T * B, E)
    gx = jnp.dot(x2d.astype(matmul_dtype), wih_p.astype(matmul_dtype),
                 precision=proj_prec, preferred_element_type=f32) + bias_p
    # Zero pad is exact: padded hidden columns provably stay 0, padded batch
    # rows / tail timesteps are masked out of the accumulator.
    gx_p = jnp.zeros((Tp, Bp, 4 * Hp), f32).at[:T, :B, :].set(
        gx.reshape(T, B, 4 * Hp))
    m_p = jnp.zeros((Tp, Bp, 1), f32).at[:T, :B, 0].set(jnp.asarray(mask, f32))

    # ---- masked-mean denominator precomputed outside the kernel --------------
    denom = jnp.sum(jnp.asarray(mask, f32), axis=0) + jnp.float32(0.001)  # (B,)
    inv_p = jnp.zeros((Bp, 1), f32).at[:B, 0].set(1.0 / denom)

    kernel = functools.partial(_lstm_chunk_kernel,
                               t_chunk=t_chunk, h_pad=Hp, unroll=unroll)

    itemsize = jnp.dtype(matmul_dtype).itemsize
    cost = pl.CostEstimate(
        flops=2 * Tp * Bp * Hp * 4 * Hp,
        transcendentals=5 * Tp * Bp * Hp,
        bytes_accessed=(Tp * Bp * 4 * Hp * 4 + Tp * Bp * 4
                        + Hp * 4 * Hp * itemsize + Bp * 4 + Bp * Hp * 4),
    )

    # VMEM budget from actual buffer sizes (double-buffered pipelined inputs,
    # resident output, scratch carries) plus headroom.
    vmem_bytes = (2 * t_chunk * Bp * 4 * Hp * 4     # gx chunk
                  + 2 * t_chunk * Bp * 4            # mask chunk
                  + 2 * Hp * 4 * Hp * itemsize      # W_hh
                  + 2 * Bp * 4                      # inv_denom
                  + 2 * Bp * Hp * 4                 # output
                  + 3 * Bp * Hp * 4)                # h / c / acc scratch
    vmem_limit = min(64 * 1024 * 1024,
                     max(16 * 1024 * 1024, int(vmem_bytes * 1.5) + (4 << 20)))

    out_p = pl.pallas_call(
        kernel,
        out_shape=jax.ShapeDtypeStruct((Bp, Hp), f32),
        grid_spec=pltpu.PrefetchScalarGridSpec(
            num_scalar_prefetch=0,
            grid=(n_chunks,),
            in_specs=[
                pl.BlockSpec((t_chunk, Bp, 4 * Hp), lambda c: (c, 0, 0)),  # gx
                pl.BlockSpec((t_chunk, Bp, 1), lambda c: (c, 0, 0)),       # mask
                pl.BlockSpec((Hp, 4 * Hp), lambda c: (0, 0)),              # W_hh^T
                pl.BlockSpec((Bp, 1), lambda c: (0, 0)),                   # 1/denom
            ],
            out_specs=pl.BlockSpec((Bp, Hp), lambda c: (0, 0)),            # resident
            scratch_shapes=[
                pltpu.VMEM((Bp, Hp), f32),    # h carry
                pltpu.VMEM((Bp, Hp), f32),    # c carry
                pltpu.VMEM((Bp, Hp), f32),    # masked-sum accumulator
            ],
        ),
        compiler_params=pltpu.CompilerParams(
            dimension_semantics=("arbitrary",),     # time recurrence is serial
            vmem_limit_bytes=vmem_limit,
        ),
        cost_estimate=cost,
    )(gx_p, m_p, whh_p, inv_p)

    return out_p[:B, :H]


def lstm_reference(x, mask, w_ih, w_hh, b_ih, b_hh):
    """Pure-JAX reference matching PyTorch LSTM semantics (eval-mode dropout)."""
    T, B, E = x.shape
    H = w_hh.shape[1]
    hp = lax.Precision.HIGHEST
    h = jnp.zeros((B, H), jnp.float32)
    c = jnp.zeros((B, H), jnp.float32)
    outs = []
    for t in range(T):
        gates = (jnp.dot(x[t], w_ih.T, precision=hp) + b_ih
                 + jnp.dot(h, w_hh.T, precision=hp) + b_hh)
        i_g = jax.nn.sigmoid(gates[:, 0 * H:1 * H])
        f_g = jax.nn.sigmoid(gates[:, 1 * H:2 * H])
        g_g = jnp.tanh(gates[:, 2 * H:3 * H])
        o_g = jax.nn.sigmoid(gates[:, 3 * H:4 * H])
        c = f_g * c + i_g * g_g
        h = o_g * jnp.tanh(c)
        outs.append(h)
    out = jnp.stack(outs, 0) * mask[..., None]          # (T, B, H)
    out = jnp.sum(out, axis=0)                          # (B, H)
    denom = jnp.sum(mask, axis=0)[:, None] + 0.001      # (B, 1)
    return out / denom


if __name__ == "__main__":
    T, B, E, H = 8, 2, 16, 32

    key = jax.random.PRNGKey(0)
    kx, km, k1, k2, k3, k4 = jax.random.split(key, 6)

    x = jax.random.normal(kx, (T, B, E), jnp.float32)
    mask = (jax.random.uniform(km, (T, B)) > 0.3).astype(jnp.float32)

    # PyTorch-style uniform init in [-1/sqrt(H), 1/sqrt(H)]
    bound = 1.0 / (H ** 0.5)
    w_ih = jax.random.uniform(k1, (4 * H, E), jnp.float32, -bound, bound)
    w_hh = jax.random.uniform(k2, (4 * H, H), jnp.float32, -bound, bound)
    b_ih = jax.random.uniform(k3, (4 * H,), jnp.float32, -bound, bound)
    b_hh = jax.random.uniform(k4, (4 * H,), jnp.float32, -bound, bound)

    ref = lstm_reference(x, mask, w_ih, w_hh, b_ih, b_hh)

    # Default fast path: bf16 MXU inputs, f32 accumulation + f32 cell math.
    out_bf16 = jax.block_until_ready(
        lstm_forward(x, mask, w_ih, w_hh, b_ih, b_hh))
    assert out_bf16.shape == (B, H)
    assert jnp.allclose(out_bf16, ref, atol=2e-2, rtol=2e-2), \
        "bf16 kernel mismatch vs reference"

    # f32 MXU path (highest precision; Mosaic multi-pass matmul in-kernel).
    out_f32 = jax.block_until_ready(
        lstm_forward(x, mask, w_ih, w_hh, b_ih, b_hh,
                     matmul_dtype=jnp.float32))
    assert jnp.allclose(out_f32, ref, atol=3e-3, rtol=3e-3), \
        "f32 kernel mismatch vs reference"

    # TODO(synk): dropout(p=0.2) is identity here (eval-mode); training-mode RNG
    # dropout could be added with pltpu.prng_seed / pltpu.stateful_bernoulli.
    print("KERNEL_OK")
</pallas_src>

<mosaic_0001>
module attributes {stable_mosaic.version = 11 : i64} {
  func.func @_lstm_chunk_kernel(%arg0: i32, %arg1: memref<8x8x512xf32, #tpu.memory_space<vmem>>, %arg2: memref<8x8x1xf32, #tpu.memory_space<vmem>>, %arg3: memref<128x512xbf16, #tpu.memory_space<vmem>>, %arg4: memref<8x1xf32, #tpu.memory_space<vmem>>, %arg5: memref<8x128xf32, #tpu.memory_space<vmem>>, %arg6: memref<8x128xf32, #tpu.memory_space<vmem>>, %arg7: memref<8x128xf32, #tpu.memory_space<vmem>>, %arg8: memref<8x128xf32, #tpu.memory_space<vmem>>) attributes {dimension_semantics = [#tpu.dimension_semantics<arbitrary>], iteration_bounds = array<i64: 1>, scalar_prefetch = 0 : i64, scratch_operands = 3 : i64, tpu.core_type = #tpu.core_type<tc>, window_params = [{transform_indices = @transform_0, window_bounds = array<i64: 8, 8, 512>}, {transform_indices = @transform_1, window_bounds = array<i64: 8, 8, 1>}, {pipeline_mode = #tpu.pipeline_mode<synchronous>, transform_indices = @transform_2, window_bounds = array<i64: 128, 512>}, {pipeline_mode = #tpu.pipeline_mode<synchronous>, transform_indices = @transform_3, window_bounds = array<i64: 8, 1>}, {pipeline_mode = #tpu.pipeline_mode<synchronous>, transform_indices = @transform_4, window_bounds = array<i64: 8, 128>}]} {
    %c0_i32 = arith.constant 0 : i32
    %0 = arith.cmpi eq, %arg0, %c0_i32 : i32
    %1 = arith.extui %0 : i1 to i32
    %c0_i32_0 = arith.constant 0 : i32
    %2 = arith.cmpi ne, %1, %c0_i32_0 : i32
    scf.if %2 {
      %cst_64 = arith.constant 0.000000e+00 : f32
      %237 = vector.broadcast %cst_64 : f32 to vector<8x128xf32>
      %c0_65 = arith.constant 0 : index
      %c0_66 = arith.constant 0 : index
      %238 = vector.load %arg6[%c0_65, %c0_66] : memref<8x128xf32, #tpu.memory_space<vmem>>, vector<8x128xf32>
      tpu.vector_store %arg6[%c0_65, %c0_66], %237 {strides = array<i32>} : memref<8x128xf32, #tpu.memory_space<vmem>>, vector<8x128xf32>,
      %cst_67 = arith.constant 0.000000e+00 : f32
      %239 = vector.broadcast %cst_67 : f32 to vector<8x128xf32>
      %c0_68 = arith.constant 0 : index
      %c0_69 = arith.constant 0 : index
      %240 = vector.load %arg7[%c0_68, %c0_69] : memref<8x128xf32, #tpu.memory_space<vmem>>, vector<8x128xf32>
      tpu.vector_store %arg7[%c0_68, %c0_69], %239 {strides = array<i32>} : memref<8x128xf32, #tpu.memory_space<vmem>>, vector<8x128xf32>,
      %cst_70 = arith.constant 0.000000e+00 : f32
      %241 = vector.broadcast %cst_70 : f32 to vector<8x128xf32>
      %c0_71 = arith.constant 0 : index
      %c0_72 = arith.constant 0 : index
      %242 = vector.load %arg8[%c0_71, %c0_72] : memref<8x128xf32, #tpu.memory_space<vmem>>, vector<8x128xf32>
      tpu.vector_store %arg8[%c0_71, %c0_72], %241 {strides = array<i32>} : memref<8x128xf32, #tpu.memory_space<vmem>>, vector<8x128xf32>,
    } else {
    }
    %c0 = arith.constant 0 : index
    %c0_1 = arith.constant 0 : index
    %3 = vector.load %arg3[%c0, %c0_1] : memref<128x512xbf16, #tpu.memory_space<vmem>>, vector<128x512xbf16>
    %c0_2 = arith.constant 0 : index
    %c0_3 = arith.constant 0 : index
    %4 = vector.load %arg6[%c0_2, %c0_3] : memref<8x128xf32, #tpu.memory_space<vmem>>, vector<8x128xf32>
    %c0_4 = arith.constant 0 : index
    %c0_5 = arith.constant 0 : index
    %5 = vector.load %arg7[%c0_4, %c0_5] : memref<8x128xf32, #tpu.memory_space<vmem>>, vector<8x128xf32>
    %c0_6 = arith.constant 0 : index
    %c0_7 = arith.constant 0 : index
    %6 = vector.load %arg8[%c0_6, %c0_7] : memref<8x128xf32, #tpu.memory_space<vmem>>, vector<8x128xf32>
    %c0_i32_8 = arith.constant 0 : i32
    %7 = arith.index_cast %c0_i32_8 : i32 to index
    %c0_9 = arith.constant 0 : index
    %c0_10 = arith.constant 0 : index
    %8 = vector.load %arg2[%7, %c0_9, %c0_10] : memref<8x8x1xf32, #tpu.memory_space<vmem>>, vector<1x8x1xf32>
    %9 = vector.shape_cast %8 : vector<1x8x1xf32> to vector<8x1xf32>
    %10 = arith.index_cast %c0_i32_8 : i32 to index
    %c0_11 = arith.constant 0 : index
    %c0_12 = arith.constant 0 : index
    %11 = vector.load %arg1[%10, %c0_11, %c0_12] : memref<8x8x512xf32, #tpu.memory_space<vmem>>, vector<1x8x512xf32>
    %12 = vector.shape_cast %11 : vector<1x8x512xf32> to vector<8x512xf32>
    %13 = arith.truncf %4 : vector<8x128xf32> to vector<8x128xbf16>
    %cst = arith.constant dense<0.000000e+00> : vector<8x512xf32>
    %14 = tpu.matmul %13, %3, %cst {dimension_numbers = #tpu.dot_dimension_numbers<[1], [0], [0], [1], [0, 0, 1, 1], [], []>} : vector<8x128xbf16>, vector<128x512xbf16>, vector<8x512xf32> -> vector<8x512xf32>
    %15 = arith.addf %12, %14 : vector<8x512xf32>
    %16 = vector.extract_strided_slice %15 {offsets = [0, 0], sizes = [8, 384], strides = [1, 1]} : vector<8x512xf32> to vector<8x384xf32>
    %17 = arith.negf %16 : vector<8x384xf32>
    %18 = math.exp %17 : vector<8x384xf32>
    %cst_13 = arith.constant 1.000000e+00 : f32
    %19 = vector.broadcast %cst_13 : f32 to vector<8x384xf32>
    %20 = arith.addf %19, %18 : vector<8x384xf32>
    %21 = arith.divf %19, %20 : vector<8x384xf32>
    %22 = vector.extract_strided_slice %21 {offsets = [0, 0], sizes = [8, 128], strides = [1, 1]} : vector<8x384xf32> to vector<8x128xf32>
    %23 = vector.extract_strided_slice %21 {offsets = [0, 128], sizes = [8, 128], strides = [1, 1]} : vector<8x384xf32> to vector<8x128xf32>
    %24 = vector.extract_strided_slice %21 {offsets = [0, 256], sizes = [8, 128], strides = [1, 1]} : vector<8x384xf32> to vector<8x128xf32>
    %25 = vector.extract_strided_slice %15 {offsets = [0, 384], sizes = [8, 128], strides = [1, 1]} : vector<8x512xf32> to vector<8x128xf32>
    %26 = math.tanh %25 : vector<8x128xf32>
    %27 = arith.mulf %23, %5 : vector<8x128xf32>
    %28 = arith.mulf %22, %26 : vector<8x128xf32>
    %29 = arith.addf %27, %28 : vector<8x128xf32>
    %30 = math.tanh %29 : vector<8x128xf32>
    %31 = arith.mulf %24, %30 : vector<8x128xf32>
    %32 = vector.broadcast %9 : vector<8x1xf32> to vector<8x128xf32>
    %33 = arith.mulf %31, %32 : vector<8x128xf32>
    %34 = arith.addf %6, %33 : vector<8x128xf32>
    %c1_i32 = arith.constant 1 : i32
    %35 = arith.index_cast %c1_i32 : i32 to index
    %c0_14 = arith.constant 0 : index
    %c0_15 = arith.constant 0 : index
    %36 = vector.load %arg2[%35, %c0_14, %c0_15] : memref<8x8x1xf32, #tpu.memory_space<vmem>>, vector<1x8x1xf32>
    %37 = vector.shape_cast %36 : vector<1x8x1xf32> to vector<8x1xf32>
    %38 = arith.index_cast %c1_i32 : i32 to index
    %c0_16 = arith.constant 0 : index
    %c0_17 = arith.constant 0 : index
    %39 = vector.load %arg1[%38, %c0_16, %c0_17] : memref<8x8x512xf32, #tpu.memory_space<vmem>>, vector<1x8x512xf32>
    %40 = vector.shape_cast %39 : vector<1x8x512xf32> to vector<8x512xf32>
    %41 = arith.truncf %31 : vector<8x128xf32> to vector<8x128xbf16>
    %cst_18 = arith.constant dense<0.000000e+00> : vector<8x512xf32>
    %42 = tpu.matmul %41, %3, %cst_18 {dimension_numbers = #tpu.dot_dimension_numbers<[1], [0], [0], [1], [0, 0, 1, 1], [], []>} : vector<8x128xbf16>, vector<128x512xbf16>, vector<8x512xf32> -> vector<8x512xf32>
    %43 = arith.addf %40, %42 : vector<8x512xf32>
    %44 = vector.extract_strided_slice %43 {offsets = [0, 0], sizes = [8, 384], strides = [1, 1]} : vector<8x512xf32> to vector<8x384xf32>
    %45 = arith.negf %44 : vector<8x384xf32>
    %46 = math.exp %45 : vector<8x384xf32>
    %cst_19 = arith.constant 1.000000e+00 : f32
    %47 = vector.broadcast %cst_19 : f32 to vector<8x384xf32>
    %48 = arith.addf %47, %46 : vector<8x384xf32>
    %49 = arith.divf %47, %48 : vector<8x384xf32>
    %50 = vector.extract_strided_slice %49 {offsets = [0, 0], sizes = [8, 128], strides = [1, 1]} : vector<8x384xf32> to vector<8x128xf32>
    %51 = vector.extract_strided_slice %49 {offsets = [0, 128], sizes = [8, 128], strides = [1, 1]} : vector<8x384xf32> to vector<8x128xf32>
    %52 = vector.extract_strided_slice %49 {offsets = [0, 256], sizes = [8, 128], strides = [1, 1]} : vector<8x384xf32> to vector<8x128xf32>
    %53 = vector.extract_strided_slice %43 {offsets = [0, 384], sizes = [8, 128], strides = [1, 1]} : vector<8x512xf32> to vector<8x128xf32>
    %54 = math.tanh %53 : vector<8x128xf32>
    %55 = arith.mulf %51, %29 : vector<8x128xf32>
    %56 = arith.mulf %50, %54 : vector<8x128xf32>
    %57 = arith.addf %55, %56 : vector<8x128xf32>
    %58 = math.tanh %57 : vector<8x128xf32>
    %59 = arith.mulf %52, %58 : vector<8x128xf32>
    %60 = vector.broadcast %37 : vector<8x1xf32> to vector<8x128xf32>
    %61 = arith.mulf %59, %60 : vector<8x128xf32>
    %62 = arith.addf %34, %61 : vector<8x128xf32>
    %c2_i32 = arith.constant 2 : i32
    %63 = arith.index_cast %c2_i32 : i32 to index
    %c0_20 = arith.constant 0 : index
    %c0_21 = arith.constant 0 : index
    %64 = vector.load %arg2[%63, %c0_20, %c0_21] : memref<8x8x1xf32, #tpu.memory_space<vmem>>, vector<1x8x1xf32>
    %65 = vector.shape_cast %64 : vector<1x8x1xf32> to vector<8x1xf32>
    %66 = arith.index_cast %c2_i32 : i32 to index
    %c0_22 = arith.constant 0 : index
    %c0_23 = arith.constant 0 : index
    %67 = vector.load %arg1[%66, %c0_22, %c0_23] : memref<8x8x512xf32, #tpu.memory_space<vmem>>, vector<1x8x512xf32>
    %68 = vector.shape_cast %67 : vector<1x8x512xf32> to vector<8x512xf32>
    %69 = arith.truncf %59 : vector<8x128xf32> to vector<8x128xbf16>
    %cst_24 = arith.constant dense<0.000000e+00> : vector<8x512xf32>
    %70 = tpu.matmul %69, %3, %cst_24 {dimension_numbers = #tpu.dot_dimension_numbers<[1], [0], [0], [1], [0, 0, 1, 1], [], []>} : vector<8x128xbf16>, vector<128x512xbf16>, vector<8x512xf32> -> vector<8x512xf32>
    %71 = arith.addf %68, %70 : vector<8x512xf32>
    %72 = vector.extract_strided_slice %71 {offsets = [0, 0], sizes = [8, 384], strides = [1, 1]} : vector<8x512xf32> to vector<8x384xf32>
    %73 = arith.negf %72 : vector<8x384xf32>
    %74 = math.exp %73 : vector<8x384xf32>
    %cst_25 = arith.constant 1.000000e+00 : f32
    %75 = vector.broadcast %cst_25 : f32 to vector<8x384xf32>
    %76 = arith.addf %75, %74 : vector<8x384xf32>
    %77 = arith.divf %75, %76 : vector<8x384xf32>
    %78 = vector.extract_strided_slice %77 {offsets = [0, 0], sizes = [8, 128], strides = [1, 1]} : vector<8x384xf32> to vector<8x128xf32>
    %79 = vector.extract_strided_slice %77 {offsets = [0, 128], sizes = [8, 128], strides = [1, 1]} : vector<8x384xf32> to vector<8x128xf32>
    %80 = vector.extract_strided_slice %77 {offsets = [0, 256], sizes = [8, 128], strides = [1, 1]} : vector<8x384xf32> to vector<8x128xf32>
    %81 = vector.extract_strided_slice %71 {offsets = [0, 384], sizes = [8, 128], strides = [1, 1]} : vector<8x512xf32> to vector<8x128xf32>
    %82 = math.tanh %81 : vector<8x128xf32>
    %83 = arith.mulf %79, %57 : vector<8x128xf32>
    %84 = arith.mulf %78, %82 : vector<8x128xf32>
    %85 = arith.addf %83, %84 : vector<8x128xf32>
    %86 = math.tanh %85 : vector<8x128xf32>
    %87 = arith.mulf %80, %86 : vector<8x128xf32>
    %88 = vector.broadcast %65 : vector<8x1xf32> to vector<8x128xf32>
    %89 = arith.mulf %87, %88 : vector<8x128xf32>
    %90 = arith.addf %62, %89 : vector<8x128xf32>
    %c3_i32 = arith.constant 3 : i32
    %91 = arith.index_cast %c3_i32 : i32 to index
    %c0_26 = arith.constant 0 : index
    %c0_27 = arith.constant 0 : index
    %92 = vector.load %arg2[%91, %c0_26, %c0_27] : memref<8x8x1xf32, #tpu.memory_space<vmem>>, vector<1x8x1xf32>
    %93 = vector.shape_cast %92 : vector<1x8x1xf32> to vector<8x1xf32>
    %94 = arith.index_cast %c3_i32 : i32 to index
    %c0_28 = arith.constant 0 : index
    %c0_29 = arith.constant 0 : index
    %95 = vector.load %arg1[%94, %c0_28, %c0_29] : memref<8x8x512xf32, #tpu.memory_space<vmem>>, vector<1x8x512xf32>
    %96 = vector.shape_cast %95 : vector<1x8x512xf32> to vector<8x512xf32>
    %97 = arith.truncf %87 : vector<8x128xf32> to vector<8x128xbf16>
    %cst_30 = arith.constant dense<0.000000e+00> : vector<8x512xf32>
    %98 = tpu.matmul %97, %3, %cst_30 {dimension_numbers = #tpu.dot_dimension_numbers<[1], [0], [0], [1], [0, 0, 1, 1], [], []>} : vector<8x128xbf16>, vector<128x512xbf16>, vector<8x512xf32> -> vector<8x512xf32>
    %99 = arith.addf %96, %98 : vector<8x512xf32>
    %100 = vector.extract_strided_slice %99 {offsets = [0, 0], sizes = [8, 384], strides = [1, 1]} : vector<8x512xf32> to vector<8x384xf32>
    %101 = arith.negf %100 : vector<8x384xf32>
    %102 = math.exp %101 : vector<8x384xf32>
    %cst_31 = arith.constant 1.000000e+00 : f32
    %103 = vector.broadcast %cst_31 : f32 to vector<8x384xf32>
    %104 = arith.addf %103, %102 : vector<8x384xf32>
    %105 = arith.divf %103, %104 : vector<8x384xf32>
    %106 = vector.extract_strided_slice %105 {offsets = [0, 0], sizes = [8, 128], strides = [1, 1]} : vector<8x384xf32> to vector<8x128xf32>
    %107 = vector.extract_strided_slice %105 {offsets = [0, 128], sizes = [8, 128], strides = [1, 1]} : vector<8x384xf32> to vector<8x128xf32>
    %108 = vector.extract_strided_slice %105 {offsets = [0, 256], sizes = [8, 128], strides = [1, 1]} : vector<8x384xf32> to vector<8x128xf32>
    %109 = vector.extract_strided_slice %99 {offsets = [0, 384], sizes = [8, 128], strides = [1, 1]} : vector<8x512xf32> to vector<8x128xf32>
    %110 = math.tanh %109 : vector<8x128xf32>
    %111 = arith.mulf %107, %85 : vector<8x128xf32>
    %112 = arith.mulf %106, %110 : vector<8x128xf32>
    %113 = arith.addf %111, %112 : vector<8x128xf32>
    %114 = math.tanh %113 : vector<8x128xf32>
    %115 = arith.mulf %108, %114 : vector<8x128xf32>
    %116 = vector.broadcast %93 : vector<8x1xf32> to vector<8x128xf32>
    %117 = arith.mulf %115, %116 : vector<8x128xf32>
    %118 = arith.addf %90, %117 : vector<8x128xf32>
    %c4_i32 = arith.constant 4 : i32
    %119 = arith.index_cast %c4_i32 : i32 to index
    %c0_32 = arith.constant 0 : index
    %c0_33 = arith.constant 0 : index
    %120 = vector.load %arg2[%119, %c0_32, %c0_33] : memref<8x8x1xf32, #tpu.memory_space<vmem>>, vector<1x8x1xf32>
    %121 = vector.shape_cast %120 : vector<1x8x1xf32> to vector<8x1xf32>
    %122 = arith.index_cast %c4_i32 : i32 to index
    %c0_34 = arith.constant 0 : index
    %c0_35 = arith.constant 0 : index
    %123 = vector.load %arg1[%122, %c0_34, %c0_35] : memref<8x8x512xf32, #tpu.memory_space<vmem>>, vector<1x8x512xf32>
    %124 = vector.shape_cast %123 : vector<1x8x512xf32> to vector<8x512xf32>
    %125 = arith.truncf %115 : vector<8x128xf32> to vector<8x128xbf16>
    %cst_36 = arith.constant dense<0.000000e+00> : vector<8x512xf32>
    %126 = tpu.matmul %125, %3, %cst_36 {dimension_numbers = #tpu.dot_dimension_numbers<[1], [0], [0], [1], [0, 0, 1, 1], [], []>} : vector<8x128xbf16>, vector<128x512xbf16>, vector<8x512xf32> -> vector<8x512xf32>
    %127 = arith.addf %124, %126 : vector<8x512xf32>
    %128 = vector.extract_strided_slice %127 {offsets = [0, 0], sizes = [8, 384], strides = [1, 1]} : vector<8x512xf32> to vector<8x384xf32>
    %129 = arith.negf %128 : vector<8x384xf32>
    %130 = math.exp %129 : vector<8x384xf32>
    %cst_37 = arith.constant 1.000000e+00 : f32
    %131 = vector.broadcast %cst_37 : f32 to vector<8x384xf32>
    %132 = arith.addf %131, %130 : vector<8x384xf32>
    %133 = arith.divf %131, %132 : vector<8x384xf32>
    %134 = vector.extract_strided_slice %133 {offsets = [0, 0], sizes = [8, 128], strides = [1, 1]} : vector<8x384xf32> to vector<8x128xf32>
    %135 = vector.extract_strided_slice %133 {offsets = [0, 128], sizes = [8, 128], strides = [1, 1]} : vector<8x384xf32> to vector<8x128xf32>
    %136 = vector.extract_strided_slice %133 {offsets = [0, 256], sizes = [8, 128], strides = [1, 1]} : vector<8x384xf32> to vector<8x128xf32>
    %137 = vector.extract_strided_slice %127 {offsets = [0, 384], sizes = [8, 128], strides = [1, 1]} : vector<8x512xf32> to vector<8x128xf32>
    %138 = math.tanh %137 : vector<8x128xf32>
    %139 = arith.mulf %135, %113 : vector<8x128xf32>
    %140 = arith.mulf %134, %138 : vector<8x128xf32>
    %141 = arith.addf %139, %140 : vector<8x128xf32>
    %142 = math.tanh %141 : vector<8x128xf32>
    %143 = arith.mulf %136, %142 : vector<8x128xf32>
    %144 = vector.broadcast %121 : vector<8x1xf32> to vector<8x128xf32>
    %145 = arith.mulf %143, %144 : vector<8x128xf32>
    %146 = arith.addf %118, %145 : vector<8x128xf32>
    %c5_i32 = arith.constant 5 : i32
    %147 = arith.index_cast %c5_i32 : i32 to index
    %c0_38 = arith.constant 0 : index
    %c0_39 = arith.constant 0 : index
    %148 = vector.load %arg2[%147, %c0_38, %c0_39] : memref<8x8x1xf32, #tpu.memory_space<vmem>>, vector<1x8x1xf32>
    %149 = vector.shape_cast %148 : vector<1x8x1xf32> to vector<8x1xf32>
    %150 = arith.index_cast %c5_i32 : i32 to index
    %c0_40 = arith.constant 0 : index
    %c0_41 = arith.constant 0 : index
    %151 = vector.load %arg1[%150, %c0_40, %c0_41] : memref<8x8x512xf32, #tpu.memory_space<vmem>>, vector<1x8x512xf32>
    %152 = vector.shape_cast %151 : vector<1x8x512xf32> to vector<8x512xf32>
    %153 = arith.truncf %143 : vector<8x128xf32> to vector<8x128xbf16>
    %cst_42 = arith.constant dense<0.000000e+00> : vector<8x512xf32>
    %154 = tpu.matmul %153, %3, %cst_42 {dimension_numbers = #tpu.dot_dimension_numbers<[1], [0], [0], [1], [0, 0, 1, 1], [], []>} : vector<8x128xbf16>, vector<128x512xbf16>, vector<8x512xf32> -> vector<8x512xf32>
    %155 = arith.addf %152, %154 : vector<8x512xf32>
    %156 = vector.extract_strided_slice %155 {offsets = [0, 0], sizes = [8, 384], strides = [1, 1]} : vector<8x512xf32> to vector<8x384xf32>
    %157 = arith.negf %156 : vector<8x384xf32>
    %158 = math.exp %157 : vector<8x384xf32>
    %cst_43 = arith.constant 1.000000e+00 : f32
    %159 = vector.broadcast %cst_43 : f32 to vector<8x384xf32>
    %160 = arith.addf %159, %158 : vector<8x384xf32>
    %161 = arith.divf %159, %160 : vector<8x384xf32>
    %162 = vector.extract_strided_slice %161 {offsets = [0, 0], sizes = [8, 128], strides = [1, 1]} : vector<8x384xf32> to vector<8x128xf32>
    %163 = vector.extract_strided_slice %161 {offsets = [0, 128], sizes = [8, 128], strides = [1, 1]} : vector<8x384xf32> to vector<8x128xf32>
    %164 = vector.extract_strided_slice %161 {offsets = [0, 256], sizes = [8, 128], strides = [1, 1]} : vector<8x384xf32> to vector<8x128xf32>
    %165 = vector.extract_strided_slice %155 {offsets = [0, 384], sizes = [8, 128], strides = [1, 1]} : vector<8x512xf32> to vector<8x128xf32>
    %166 = math.tanh %165 : vector<8x128xf32>
    %167 = arith.mulf %163, %141 : vector<8x128xf32>
    %168 = arith.mulf %162, %166 : vector<8x128xf32>
    %169 = arith.addf %167, %168 : vector<8x128xf32>
    %170 = math.tanh %169 : vector<8x128xf32>
    %171 = arith.mulf %164, %170 : vector<8x128xf32>
    %172 = vector.broadcast %149 : vector<8x1xf32> to vector<8x128xf32>
    %173 = arith.mulf %171, %172 : vector<8x128xf32>
    %174 = arith.addf %146, %173 : vector<8x128xf32>
    %c6_i32 = arith.constant 6 : i32
    %175 = arith.index_cast %c6_i32 : i32 to index
    %c0_44 = arith.constant 0 : index
    %c0_45 = arith.constant 0 : index
    %176 = vector.load %arg2[%175, %c0_44, %c0_45] : memref<8x8x1xf32, #tpu.memory_space<vmem>>, vector<1x8x1xf32>
    %177 = vector.shape_cast %176 : vector<1x8x1xf32> to vector<8x1xf32>
    %178 = arith.index_cast %c6_i32 : i32 to index
    %c0_46 = arith.constant 0 : index
    %c0_47 = arith.constant 0 : index
    %179 = vector.load %arg1[%178, %c0_46, %c0_47] : memref<8x8x512xf32, #tpu.memory_space<vmem>>, vector<1x8x512xf32>
    %180 = vector.shape_cast %179 : vector<1x8x512xf32> to vector<8x512xf32>
    %181 = arith.truncf %171 : vector<8x128xf32> to vector<8x128xbf16>
    %cst_48 = arith.constant dense<0.000000e+00> : vector<8x512xf32>
    %182 = tpu.matmul %181, %3, %cst_48 {dimension_numbers = #tpu.dot_dimension_numbers<[1], [0], [0], [1], [0, 0, 1, 1], [], []>} : vector<8x128xbf16>, vector<128x512xbf16>, vector<8x512xf32> -> vector<8x512xf32>
    %183 = arith.addf %180, %182 : vector<8x512xf32>
    %184 = vector.extract_strided_slice %183 {offsets = [0, 0], sizes = [8, 384], strides = [1, 1]} : vector<8x512xf32> to vector<8x384xf32>
    %185 = arith.negf %184 : vector<8x384xf32>
    %186 = math.exp %185 : vector<8x384xf32>
    %cst_49 = arith.constant 1.000000e+00 : f32
    %187 = vector.broadcast %cst_49 : f32 to vector<8x384xf32>
    %188 = arith.addf %187, %186 : vector<8x384xf32>
    %189 = arith.divf %187, %188 : vector<8x384xf32>
    %190 = vector.extract_strided_slice %189 {offsets = [0, 0], sizes = [8, 128], strides = [1, 1]} : vector<8x384xf32> to vector<8x128xf32>
    %191 = vector.extract_strided_slice %189 {offsets = [0, 128], sizes = [8, 128], strides = [1, 1]} : vector<8x384xf32> to vector<8x128xf32>
    %192 = vector.extract_strided_slice %189 {offsets = [0, 256], sizes = [8, 128], strides = [1, 1]} : vector<8x384xf32> to vector<8x128xf32>
    %193 = vector.extract_strided_slice %183 {offsets = [0, 384], sizes = [8, 128], strides = [1, 1]} : vector<8x512xf32> to vector<8x128xf32>
    %194 = math.tanh %193 : vector<8x128xf32>
    %195 = arith.mulf %191, %169 : vector<8x128xf32>
    %196 = arith.mulf %190, %194 : vector<8x128xf32>
    %197 = arith.addf %195, %196 : vector<8x128xf32>
    %198 = math.tanh %197 : vector<8x128xf32>
    %199 = arith.mulf %192, %198 : vector<8x128xf32>
    %200 = vector.broadcast %177 : vector<8x1xf32> to vector<8x128xf32>
    %201 = arith.mulf %199, %200 : vector<8x128xf32>
    %202 = arith.addf %174, %201 : vector<8x128xf32>
    %c7_i32 = arith.constant 7 : i32
    %203 = arith.index_cast %c7_i32 : i32 to index
    %c0_50 = arith.constant 0 : index
    %c0_51 = arith.constant 0 : index
    %204 = vector.load %arg2[%203, %c0_50, %c0_51] : memref<8x8x1xf32, #tpu.memory_space<vmem>>, vector<1x8x1xf32>
    %205 = vector.shape_cast %204 : vector<1x8x1xf32> to vector<8x1xf32>
    %206 = arith.index_cast %c7_i32 : i32 to index
    %c0_52 = arith.constant 0 : index
    %c0_53 = arith.constant 0 : index
    %207 = vector.load %arg1[%206, %c0_52, %c0_53] : memref<8x8x512xf32, #tpu.memory_space<vmem>>, vector<1x8x512xf32>
    %208 = vector.shape_cast %207 : vector<1x8x512xf32> to vector<8x512xf32>
    %209 = arith.truncf %199 : vector<8x128xf32> to vector<8x128xbf16>
    %cst_54 = arith.constant dense<0.000000e+00> : vector<8x512xf32>
    %210 = tpu.matmul %209, %3, %cst_54 {dimension_numbers = #tpu.dot_dimension_numbers<[1], [0], [0], [1], [0, 0, 1, 1], [], []>} : vector<8x128xbf16>, vector<128x512xbf16>, vector<8x512xf32> -> vector<8x512xf32>
    %211 = arith.addf %208, %210 : vector<8x512xf32>
    %212 = vector.extract_strided_slice %211 {offsets = [0, 0], sizes = [8, 384], strides = [1, 1]} : vector<8x512xf32> to vector<8x384xf32>
    %213 = arith.negf %212 : vector<8x384xf32>
    %214 = math.exp %213 : vector<8x384xf32>
    %cst_55 = arith.constant 1.000000e+00 : f32
    %215 = vector.broadcast %cst_55 : f32 to vector<8x384xf32>
    %216 = arith.addf %215, %214 : vector<8x384xf32>
    %217 = arith.divf %215, %216 : vector<8x384xf32>
    %218 = vector.extract_strided_slice %217 {offsets = [0, 0], sizes = [8, 128], strides = [1, 1]} : vector<8x384xf32> to vector<8x128xf32>
    %219 = vector.extract_strided_slice %217 {offsets = [0, 128], sizes = [8, 128], strides = [1, 1]} : vector<8x384xf32> to vector<8x128xf32>
    %220 = vector.extract_strided_slice %217 {offsets = [0, 256], sizes = [8, 128], strides = [1, 1]} : vector<8x384xf32> to vector<8x128xf32>
    %221 = vector.extract_strided_slice %211 {offsets = [0, 384], sizes = [8, 128], strides = [1, 1]} : vector<8x512xf32> to vector<8x128xf32>
    %222 = math.tanh %221 : vector<8x128xf32>
    %223 = arith.mulf %219, %197 : vector<8x128xf32>
    %224 = arith.mulf %218, %222 : vector<8x128xf32>
    %225 = arith.addf %223, %224 : vector<8x128xf32>
    %226 = math.tanh %225 : vector<8x128xf32>
    %227 = arith.mulf %220, %226 : vector<8x128xf32>
    %228 = vector.broadcast %205 : vector<8x1xf32> to vector<8x128xf32>
    %229 = arith.mulf %227, %228 : vector<8x128xf32>
    %230 = arith.addf %202, %229 : vector<8x128xf32>
    %c8_i32 = arith.constant 8 : i32
    %c0_56 = arith.constant 0 : index
    %c0_57 = arith.constant 0 : index
    %231 = vector.load %arg6[%c0_56, %c0_57] : memref<8x128xf32, #tpu.memory_space<vmem>>, vector<8x128xf32>
    tpu.vector_store %arg6[%c0_56, %c0_57], %227 {strides = array<i32>} : memref<8x128xf32, #tpu.memory_space<vmem>>, vector<8x128xf32>,
    %c0_58 = arith.constant 0 : index
    %c0_59 = arith.constant 0 : index
    %232 = vector.load %arg7[%c0_58, %c0_59] : memref<8x128xf32, #tpu.memory_space<vmem>>, vector<8x128xf32>
    tpu.vector_store %arg7[%c0_58, %c0_59], %225 {strides = array<i32>} : memref<8x128xf32, #tpu.memory_space<vmem>>, vector<8x128xf32>,
    %c0_60 = arith.constant 0 : index
    %c0_61 = arith.constant 0 : index
    %233 = vector.load %arg8[%c0_60, %c0_61] : memref<8x128xf32, #tpu.memory_space<vmem>>, vector<8x128xf32>
    tpu.vector_store %arg8[%c0_60, %c0_61], %230 {strides = array<i32>} : memref<8x128xf32, #tpu.memory_space<vmem>>, vector<8x128xf32>,
    %c0_i32_62 = arith.constant 0 : i32
    %234 = arith.cmpi eq, %arg0, %c0_i32_62 : i32
    %235 = arith.extui %234 : i1 to i32
    %c0_i32_63 = arith.constant 0 : i32
    %236 = arith.cmpi ne, %235, %c0_i32_63 : i32
    scf.if %236 {
      %c0_64 = arith.constant 0 : index
      %c0_65 = arith.constant 0 : index
      %237 = vector.load %arg8[%c0_64, %c0_65] : memref<8x128xf32, #tpu.memory_space<vmem>>, vector<8x128xf32>
      %c0_66 = arith.constant 0 : index
      %c0_67 = arith.constant 0 : index
      %238 = vector.load %arg4[%c0_66, %c0_67] : memref<8x1xf32, #tpu.memory_space<vmem>>, vector<8x1xf32>
      %239 = vector.broadcast %238 : vector<8x1xf32> to vector<8x128xf32>
      %240 = arith.mulf %237, %239 : vector<8x128xf32>
      %c0_68 = arith.constant 0 : index
      %c0_69 = arith.constant 0 : index
      %241 = vector.load %arg5[%c0_68, %c0_69] : memref<8x128xf32, #tpu.memory_space<vmem>>, vector<8x128xf32>
      tpu.vector_store %arg5[%c0_68, %c0_69], %240 {strides = array<i32>} : memref<8x128xf32, #tpu.memory_space<vmem>>, vector<8x128xf32>,
    } else {
    }
    return
  }
  func.func @transform_0(%arg0: i32) -> (i32, i32, i32) {
    %c0_i32 = arith.constant 0 : i32
    %c0_i32_0 = arith.constant 0 : i32
    %c0_i32_1 = arith.constant 0 : i32
    return %arg0, %c0_i32, %c0_i32_0 : i32, i32, i32
  }
  func.func @transform_1(%arg0: i32) -> (i32, i32, i32) {
    %c0_i32 = arith.constant 0 : i32
    %c0_i32_0 = arith.constant 0 : i32
    %c0_i32_1 = arith.constant 0 : i32
    return %arg0, %c0_i32, %c0_i32_0 : i32, i32, i32
  }
  func.func @transform_2(%arg0: i32) -> (i32, i32) {
    %c0_i32 = arith.constant 0 : i32
    %c0_i32_0 = arith.constant 0 : i32
    %c0_i32_1 = arith.constant 0 : i32
    return %c0_i32, %c0_i32_0 : i32, i32
  }
  func.func @transform_3(%arg0: i32) -> (i32, i32) {
    %c0_i32 = arith.constant 0 : i32
    %c0_i32_0 = arith.constant 0 : i32
    %c0_i32_1 = arith.constant 0 : i32
    return %c0_i32, %c0_i32_0 : i32, i32
  }
  func.func @transform_4(%arg0: i32) -> (i32, i32) {
    %c0_i32 = arith.constant 0 : i32
    %c0_i32_0 = arith.constant 0 : i32
    %c0_i32_1 = arith.constant 0 : i32
    return %c0_i32, %c0_i32_0 : i32, i32
  }
}

</mosaic_0001>

<bundles_post_ra>
// kernel: tpu_custom_call.1
= control target key start
LH: loop header
LB: loop body
LE: loop exit
PB: predicated region body
PF: predicated region fallthrough
CT: control target
= control target key end

     0   :  { %9 = vsyncpa [#allocation6], 0  ;;  %s2091_s0 = inlined_call_operand.hbm [shape: f32[8,8,512], index: 0, kind: input, shape index: {}]   ;;  %s2092_s1 = inlined_call_operand.vmem [shape: f32[8,8,1], index: 1, kind: input, shape index: {}]   ;;  %s2093_s2 = inlined_call_operand.hbm [shape: bf16[128,512], index: 2, kind: input, shape index: {}]   ;;  %s2094_s3 = inlined_call_operand.vmem [shape: f32[8,1], index: 3, kind: input, shape index: {}]   ;;  %s2095_s4 = inlined_call_operand.hbm [shape: f32[8,128], index: 4, kind: output, shape index: {}]  }
   0x1   :  { %10 = vsyncpa [#allocation9], 0 }
   0x2   :  { %11 = vsyncpa [#allocation7], 0  ;;  %s1632_s15 = smov [#allocation5]   ;;  %s1560_s19 = scalar_lea.hbm %s2091_s0, 4096 }
   0x3   :  { %s17_s16 = sshll.u32 %s1632_s15, 4  ;;  %p1561_p0 = scmp.ne.s32.totalorder %s2091_s0, %s1560_s19  ;;  %s18_s16 = int_to_ptr.vmem [resolvable:$true] %s17_s16 }
   0x4   :  { %p1564_p1 = scmp.lt.u32.totalorder %s1560_s19, %s2091_s0 }
   0x6   :  { %p1566_p2 = pnand %p1564_p1, %p1561_p0 }
   0x8   :  { %1569 = shalt.err (!%p1566_p2)
}
   0x9   :  { %s1570_s24 = scalar_lea.vmem %s18_s16, 4096  ;;  %p1575_p4 = scmp.lt.s32.totalorder %s18_s16, %s18_s16 }
   0xa   :  { %p1571_p3 = scmp.ne.s32.totalorder %s18_s16, %s1570_s24  ;;  %p1576_p5 = scmp.lt.s32.totalorder %s1570_s24, %s1570_s24 }
   0xc   :  { %p1577_p6 = por %p1576_p5, %p1575_p4 }
   0xe   :  { %p1578_p7 = pnand %p1577_p6, %p1571_p3 }
  0x10   :  { %1581 = shalt.err (!%p1578_p7)
}
  0x11   :  { %s1633_s25 = smov 512   ;;  %s1634_s26 = smov 32  }
  0x12   :  { %23 = dma.hbm_to_vmem [thread:$0]  %s2091_s0, 4096, %s18_s16, [#allocation6], %s1633_s25, %s1633_s25, %s1634_s26  }
  0x13   :  { %s1635_s29 = smov [#allocation8]   ;;  %s1582_s7 = scalar_lea.hbm %s2093_s2, 4096 }
  0x14   :  { %s31_s30 = sshll.u32 %s1635_s29, 4  ;;  %p1583_p8 = scmp.ne.s32.totalorder %s2093_s2, %s1582_s7  ;;  %s32_s30 = int_to_ptr.vmem [resolvable:$true] %s31_s30 }
  0x15   :  { %p1586_p9 = scmp.lt.u32.totalorder %s1582_s7, %s2093_s2 }
  0x17   :  { %p1588_p10 = pnand %p1586_p9, %p1583_p8 }
  0x19   :  { %1591 = shalt.err (!%p1588_p10)
}
  0x1a   :  { %s1592_s12 = scalar_lea.vmem %s32_s30, 4096  ;;  %p1597_p12 = scmp.lt.s32.totalorder %s32_s30, %s32_s30 }
  0x1b   :  { %p1593_p11 = scmp.ne.s32.totalorder %s32_s30, %s1592_s12  ;;  %p1598_p13 = scmp.lt.s32.totalorder %s1592_s12, %s1592_s12 }
  0x1d   :  { %p1599_p0 = por %p1598_p13, %p1597_p12 }
  0x1f   :  { %p1600_p1 = pnand %p1599_p0, %p1593_p11 }
  0x21   :  { %1603 = shalt.err (!%p1600_p1)
}
  0x22   :  { %s1636_s0 = smov 256   ;;  %s1637_s13 = smov 16  }
  0x23   :  { %37 = dma.hbm_to_vmem [thread:$0]  %s2093_s2, 4096, %s32_s30, [#allocation9], %s1636_s0, %s1636_s0, %s1637_s13  }
  0x24   :  { %1626 = dma.done.wait [#allocation6], 4096  }
  0x25   :  { %1627 = vsyncadd [#allocation6], 4294963200 }
  0x26   :  { %1628 = dma.done.wait [#allocation9], 4096  }
  0x27   :  { %1629 = vsyncadd [#allocation9], 4294963200  ;;  %v1638_v0 = vmov 0   ;;  %v1694_v1 = vld [vmem:[#allocation8 + $0x4] ss:$16 sps:$4 sm:$0xff]   ;;  %v1639_v34 = vmov 0.0|0.0  }
  0x28   :  { %287 = vmatprep.mubr.bf16.mxu0 %v1638_v0  ;;  %328 = vmatprep.mubr.bf16.mxu1 %v1638_v0  ;;  %v1696_v2 = vld [vmem:[#allocation8] ss:$16 sps:$4 sm:$0xff]   ;;  %v1699_v3 = vld [vmem:[#allocation8 + $0x24] ss:$16 sps:$4 sm:$0xff]   ;;  %v1707_v6 = vld [vmem:[#allocation8 + $0xc] ss:$16 sps:$4 sm:$0xff]  }
  0x29   :  { %1350 = vset.pattern.permute.xlu0 %v1638_v0  ;;  %1351 = vset.pattern.permute.xlu1 %v1638_v0  ;;  %v1702_v4 = vld [vmem:[#allocation8 + $0x20] ss:$16 sps:$4 sm:$0xff]   ;;  %v1705_v5 = vld [vmem:[#allocation8 + $0x44] ss:$16 sps:$4 sm:$0xff]   ;;  %v1709_v7 = vld [vmem:[#allocation8 + $0x8] ss:$16 sps:$4 sm:$0xff]  }
  0x2a   :  { %255 = vmatprep.subr.bf16.mxu0 %v1694_v1  ;;  %v1712_v8 = vld [vmem:[#allocation8 + $0x40] ss:$16 sps:$4 sm:$0xff]   ;;  %296 = vmatprep.subr.bf16.mxu1 %v1707_v6  ;;  %v1716_v9 = vld [vmem:[#allocation8 + $0x64] ss:$16 sps:$4 sm:$0xff]   ;;  %v1719_v10 = vld [vmem:[#allocation8 + $0x2c] ss:$16 sps:$4 sm:$0xff]  }
  0x2b   :  { %256 = vmatpush1.bf16.msra.mxu0 %v1696_v2  ;;  %297 = vmatpush1.bf16.msra.mxu1 %v1709_v7  ;;  %v1721_v11 = vld [vmem:[#allocation8 + $0x28] ss:$16 sps:$4 sm:$0xff]   ;;  %v1725_v12 = vld [vmem:[#allocation8 + $0x60] ss:$16 sps:$4 sm:$0xff]   ;;  %v1727_v13 = vld [vmem:[#allocation8 + $0x84] ss:$16 sps:$4 sm:$0xff]  }
  0x2c   :  { %257 = vmatprep.subr.bf16.mxu0 %v1699_v3  ;;  %298 = vmatprep.subr.bf16.mxu1 %v1719_v10  ;;  %v1729_v14 = vld [vmem:[#allocation8 + $0x4c] ss:$16 sps:$4 sm:$0xff]   ;;  %v1733_v15 = vld [vmem:[#allocation8 + $0x48] ss:$16 sps:$4 sm:$0xff]   ;;  %v1739_v17 = vld [vmem:[#allocation8 + $0x80] ss:$16 sps:$4 sm:$0xff]  }
  0x2d   :  { %v1736_v16 = vld [vmem:[#allocation8 + $0x6c] ss:$16 sps:$4 sm:$0xff]   ;;  %v1742_v18 = vld [vmem:[#allocation8 + $0xa4] ss:$16 sps:$4 sm:$0xff]   ;;  %v1745_v19 = vld [vmem:[#allocation8 + $0x68] ss:$16 sps:$4 sm:$0xff]  }
  0x2e   :  { %v1748_v20 = vld [vmem:[#allocation8 + $0x8c] ss:$16 sps:$4 sm:$0xff]   ;;  %v1751_v21 = vld [vmem:[#allocation8 + $0xa0] ss:$16 sps:$4 sm:$0xff]   ;;  %v1753_v22 = vld [vmem:[#allocation8 + $0xc4] ss:$16 sps:$4 sm:$0xff]  }
  0x2f   :  { %258 = vmatpush1.bf16.msra.mxu0 %v1702_v4  ;;  %299 = vmatpush1.bf16.msra.mxu1 %v1721_v11  ;;  %v1757_v23 = vld [vmem:[#allocation8 + $0x88] ss:$16 sps:$4 sm:$0xff]   ;;  %v1760_v24 = vld [vmem:[#allocation8 + $0xac] ss:$16 sps:$4 sm:$0xff]   ;;  %v89_v25 = vld [vmem:[%s2092_s1] sm:$0xff] }
  0x30   :  { %259 = vmatprep.subr.bf16.mxu0 %v1705_v5  ;;  %300 = vmatprep.subr.bf16.mxu1 %v1729_v14  ;;  %v1766_v26 = vld [vmem:[#allocation8 + $0xc0] ss:$16 sps:$4 sm:$0xff]   ;;  %v1769_v27 = vld [vmem:[#allocation8 + $0xe4] ss:$16 sps:$4 sm:$0xff]   ;;  %v1772_v28 = vld [vmem:[#allocation8 + $0xa8] ss:$16 sps:$4 sm:$0xff]  }
  0x31   :  { %367 = vperm.xlu0 %1350, %v89_v25   ;;  %v1775_v29 = vld [vmem:[#allocation8 + $0xcc] ss:$16 sps:$4 sm:$0xff]   ;;  %v1778_v30 = vld [vmem:[#allocation8 + $0xe0] ss:$16 sps:$4 sm:$0xff]   ;;  %v1782_v31 = vld [vmem:[#allocation8 + $0xc8] ss:$16 sps:$4 sm:$0xff]  }
  0x32   :  { %v1785_v32 = vld [vmem:[#allocation8 + $0xec] ss:$16 sps:$4 sm:$0xff]   ;;  %v1789_v33 = vld [vmem:[#allocation8 + $0xe8] ss:$16 sps:$4 sm:$0xff]   ;;  %v90_v36 = vld [vmem:[#allocation5] sm:$0xff] }
  0x33   :  { %260 = vmatpush1.bf16.msra.mxu0 %v1712_v8  ;;  %301 = vmatpush1.bf16.msra.mxu1 %v1733_v15  ;;  %v1313_v35 = vld [vmem:[%s2092_s1 + $0x8] sm:$0xff]  ;;  %v92_v46 = vld [vmem:[#allocation5 + $0x10] sm:$0xff]  ;;  %v93_v52 = vld [vmem:[#allocation5 + $0x18] sm:$0xff] }
  0x34   :  { %261 = vmatprep.subr.bf16.mxu0 %v1716_v9  ;;  %302 = vmatprep.subr.bf16.mxu1 %v1736_v16  ;;  %v91_v37 = vld [vmem:[#allocation5 + $0x8] sm:$0xff] }
  0x35   :  { %492 = vperm.xlu0 %1350, %v1313_v35  }
  0x37   :  { %262 = vmatpush1.bf16.msra.mxu0 %v1725_v12  ;;  %303 = vmatpush1.bf16.msra.mxu1 %v1745_v19 }
  0x38   :  { %263 = vmatprep.subr.bf16.mxu0 %v1727_v13  ;;  %304 = vmatprep.subr.bf16.mxu1 %v1748_v20 }
  0x3b   :  { %264 = vmatpush1.bf16.msra.mxu0 %v1739_v17  ;;  %305 = vmatpush1.bf16.msra.mxu1 %v1757_v23 }
  0x3c   :  { %265 = vmatprep.subr.bf16.mxu0 %v1742_v18  ;;  %306 = vmatprep.subr.bf16.mxu1 %v1760_v24 }
  0x3f   :  { %266 = vmatpush1.bf16.msra.mxu0 %v1751_v21  ;;  %307 = vmatpush1.bf16.msra.mxu1 %v1772_v28 }
  0x40   :  { %267 = vmatprep.subr.bf16.mxu0 %v1753_v22  ;;  %308 = vmatprep.subr.bf16.mxu1 %v1775_v29 }
  0x43   :  { %268 = vmatpush1.bf16.msra.mxu0 %v1766_v26  ;;  %309 = vmatpush1.bf16.msra.mxu1 %v1782_v31 }
  0x44   :  { %269 = vmatprep.subr.bf16.mxu0 %v1769_v27  ;;  %310 = vmatprep.subr.bf16.mxu1 %v1785_v32 }
  0x47   :  { %270 = vmatpush1.bf16.msra.mxu0 %v1778_v30  ;;  %311 = vmatpush1.bf16.msra.mxu1 %v1789_v33 }
  0x48   :  { %380 = vmatprep.subr.bf16.mxu0 %v1694_v1  ;;  %421 = vmatprep.subr.bf16.mxu1 %v1707_v6 }
  0x4a   :  { %288 = vmatmul.mubr.bf16.vlgmr.msra.gmra.mrb[0].mxu0 %v1639_v34  ;;  %329 = vmatmul.mubr.bf16.vlgmr.msra.gmra.mrb[0].mxu1 %v1639_v34 }
  0x4b   :  { %381 = vmatpush1.bf16.msra.mxu0 %v1696_v2  ;;  %412 = vmatprep.mubr.bf16.mxu0 %v1638_v0 }
  0x4c   :  { %382 = vmatprep.subr.bf16.mxu0 %v1699_v3  ;;  %422 = vmatpush1.bf16.msra.mxu1 %v1709_v7 }
  0x4d   :  { %423 = vmatprep.subr.bf16.mxu1 %v1719_v10  ;;  %453 = vmatprep.mubr.bf16.mxu1 %v1638_v0 }
  0x4f   :  { %383 = vmatpush1.bf16.msra.mxu0 %v1702_v4 }
  0x50   :  { %384 = vmatprep.subr.bf16.mxu0 %v1705_v5  ;;  %424 = vmatpush1.bf16.msra.mxu1 %v1721_v11 }
  0x51   :  { %425 = vmatprep.subr.bf16.mxu1 %v1729_v14 }
  0x53   :  { %385 = vmatpush1.bf16.msra.mxu0 %v1712_v8 }
  0x54   :  { %386 = vmatprep.subr.bf16.mxu0 %v1716_v9  ;;  %426 = vmatpush1.bf16.msra.mxu1 %v1733_v15 }
  0x55   :  { %427 = vmatprep.subr.bf16.mxu1 %v1736_v16 }
  0x57   :  { %387 = vmatpush1.bf16.msra.mxu0 %v1725_v12 }
  0x58   :  { %388 = vmatprep.subr.bf16.mxu0 %v1727_v13  ;;  %428 = vmatpush1.bf16.msra.mxu1 %v1745_v19 }
  0x59   :  { %429 = vmatprep.subr.bf16.mxu1 %v1748_v20 }
  0x5b   :  { %389 = vmatpush1.bf16.msra.mxu0 %v1739_v17 }
  0x5c   :  { %390 = vmatprep.subr.bf16.mxu0 %v1742_v18  ;;  %430 = vmatpush1.bf16.msra.mxu1 %v1757_v23 }
  0x5d   :  { %431 = vmatprep.subr.bf16.mxu1 %v1760_v24 }
  0x5f   :  { %391 = vmatpush1.bf16.msra.mxu0 %v1751_v21 }
  0x60   :  { %392 = vmatprep.subr.bf16.mxu0 %v1753_v22  ;;  %432 = vmatpush1.bf16.msra.mxu1 %v1772_v28 }
  0x61   :  { %433 = vmatprep.subr.bf16.mxu1 %v1775_v29 }
  0x63   :  { %393 = vmatpush1.bf16.msra.mxu0 %v1766_v26 }
  0x64   :  { %394 = vmatprep.subr.bf16.mxu0 %v1769_v27  ;;  %434 = vmatpush1.bf16.msra.mxu1 %v1782_v31 }
  0x65   :  { %435 = vmatprep.subr.bf16.mxu1 %v1785_v32 }
  0x67   :  { %395 = vmatpush1.bf16.msra.mxu0 %v1778_v30 }
  0x68   :  { %505 = vmatprep.subr.bf16.mxu0 %v1694_v1  ;;  %436 = vmatpush1.bf16.msra.mxu1 %v1789_v33 }
  0x69   :  { %546 = vmatprep.subr.bf16.mxu1 %v1707_v6 }
 0x11d   :  { %v289_v38 = vpop.f32.mrb[0].mxu0  ;;  %v330_v47 = vpop.f32.mrb[0].mxu1 }
 0x11e   :  { %v337_v39 = vadd.f32 %v289_v38, %v90_v36  ;;  %v291_v40 = vpop.f32.mrb[1].mxu0  ;;  %v332_v48 = vpop.f32.mrb[1].mxu1  ;;  %v339_v49 = vadd.f32 %v330_v47, %v92_v46 }
 0x11f   :  { %v338_v41 = vadd.f32 %v291_v40, %v91_v37  ;;  %v293_v42 = vpop.f32.mrb[2].mxu0  ;;  %v334_v50 = vpop.f32.mrb[2].mxu1  ;;  %v340_v54 = vadd.f32 %v332_v48, %v93_v52  ;;  %v1317_v40 = vld [vmem:[%s2092_s1 + $0x10] sm:$0xff] }
 0x120   :  { %v1310_v43 = vmul.f32 -1.442695, %v337_v39  ;;  %v294_v44 = vpop.f32.mrb[3].mxu0  ;;  %v335_v51 = vpop.f32.mrb[3].mxu1  ;;  %v1312_v53 = vmul.f32 -1.442695, %v339_v49  ;;  %617 = vperm.xlu1 %1351, %v1317_v40  }
 0x121   :  { %v1311_v45 = vmul.f32 -1.442695, %v338_v41  ;;  %v375_v41 = vld [vmem:[#allocation5 + $0x20] sm:$0xff]  ;;  %v376_v42 = vld [vmem:[#allocation5 + $0x28] sm:$0xff] }
 0x122   :  { %1400 = vpow2.f32 %v1310_v43 }
 0x123   :  { %1402 = vpow2.f32 %v1311_v45 }
 0x124   :  { %1404 = vpow2.f32 %v1312_v53 }
 0x125   :  { %1406 = vtanh.f32 %v340_v54 }
 0x12c   :  { %v1401_v55 = vpop.eup %1400 }
 0x12d   :  { %v1403_v56 = vpop.eup %1402  ;;  %v350_v57 = vadd.f32 1.0, %v1401_v55  ;;  %v377_v55 = vld [vmem:[#allocation5 + $0x30] sm:$0xff] }
 0x12e   :  { %v351_v58 = vadd.f32 1.0, %v1403_v56  ;;  %v1405_v59 = vpop.eup %1404 }
 0x12f   :  { %1408 = vrcp.f32 %v350_v57  ;;  %v1407_v60 = vpop.eup %1406  ;;  %v352_v62 = vadd.f32 1.0, %v1405_v59  ;;  %v378_v57 = vld [vmem:[#allocation5 + $0x38] sm:$0xff] }
 0x130   :  { %1410 = vrcp.f32 %v351_v58 }
 0x131   :  { %1412 = vrcp.f32 %v352_v62 }
 0x139   :  { %v1409_v61 = vpop.eup %1408 }
 0x13a   :  { %v1411_v63 = vpop.eup %1410  ;;  %v361_v25 = vmul.f32 %v1409_v61, %v1407_v60 }
 0x13b   :  { %v360_v34 = vmul.f32 0.0, %v1411_v63  ;;  %v1413_v36 = vpop.eup %1412 }
 0x13d   :  { %v1832_v35 = vadd.f32 %v361_v25, %v360_v34 }
 0x13f   :  { %1414 = vtanh.f32 %v1832_v35 }
 0x149   :  { %v1415_v37 = vpop.eup %1414 }
 0x14a   :  { %v1835_v38 = vmul.f32 %v1415_v37, %v1413_v36 }
 0x14c   :  { %v379_v39 = vpack.c.bf16 %v1835_v38, %v1835_v38 }
 0x14e   :  { %413 = vmatmul.mubr.bf16.vlgmr.msra.gmra.mrb[4].mxu0 %v379_v39  ;;  %454 = vmatmul.mubr.bf16.vlgmr.msra.gmra.mrb[4].mxu1 %v379_v39 }
 0x14f   :  { %506 = vmatpush1.bf16.msra.mxu0 %v1696_v2  ;;  %547 = vmatpush1.bf16.msra.mxu1 %v1709_v7 }
 0x150   :  { %507 = vmatprep.subr.bf16.mxu0 %v1699_v3  ;;  %548 = vmatprep.subr.bf16.mxu1 %v1719_v10 }
 0x151   :  { %537 = vmatprep.mubr.bf16.mxu0 %v1638_v0  ;;  %578 = vmatprep.mubr.bf16.mxu1 %v1638_v0 }
 0x153   :  { %508 = vmatpush1.bf16.msra.mxu0 %v1702_v4  ;;  %549 = vmatpush1.bf16.msra.mxu1 %v1721_v11 }
 0x154   :  { %509 = vmatprep.subr.bf16.mxu0 %v1705_v5  ;;  %550 = vmatprep.subr.bf16.mxu1 %v1729_v14 }
 0x157   :  { %510 = vmatpush1.bf16.msra.mxu0 %v1712_v8  ;;  %551 = vmatpush1.bf16.msra.mxu1 %v1733_v15 }
 0x158   :  { %511 = vmatprep.subr.bf16.mxu0 %v1716_v9  ;;  %552 = vmatprep.subr.bf16.mxu1 %v1736_v16 }
 0x15b   :  { %512 = vmatpush1.bf16.msra.mxu0 %v1725_v12  ;;  %553 = vmatpush1.bf16.msra.mxu1 %v1745_v19 }
 0x15c   :  { %513 = vmatprep.subr.bf16.mxu0 %v1727_v13  ;;  %554 = vmatprep.subr.bf16.mxu1 %v1748_v20 }
 0x15f   :  { %514 = vmatpush1.bf16.msra.mxu0 %v1739_v17  ;;  %555 = vmatpush1.bf16.msra.mxu1 %v1757_v23 }
 0x160   :  { %515 = vmatprep.subr.bf16.mxu0 %v1742_v18  ;;  %556 = vmatprep.subr.bf16.mxu1 %v1760_v24 }
 0x163   :  { %516 = vmatpush1.bf16.msra.mxu0 %v1751_v21  ;;  %557 = vmatpush1.bf16.msra.mxu1 %v1772_v28 }
 0x164   :  { %517 = vmatprep.subr.bf16.mxu0 %v1753_v22  ;;  %558 = vmatprep.subr.bf16.mxu1 %v1775_v29 }
 0x167   :  { %518 = vmatpush1.bf16.msra.mxu0 %v1766_v26  ;;  %559 = vmatpush1.bf16.msra.mxu1 %v1782_v31 }
 0x168   :  { %519 = vmatprep.subr.bf16.mxu0 %v1769_v27  ;;  %560 = vmatprep.subr.bf16.mxu1 %v1785_v32 }
 0x16b   :  { %520 = vmatpush1.bf16.msra.mxu0 %v1778_v30  ;;  %561 = vmatpush1.bf16.msra.mxu1 %v1789_v33 }
 0x16c   :  { %630 = vmatprep.subr.bf16.mxu0 %v1694_v1  ;;  %671 = vmatprep.subr.bf16.mxu1 %v1707_v6 }
 0x221   :  { %v414_v43 = vpop.f32.mrb[4].mxu0  ;;  %v455_v44 = vpop.f32.mrb[4].mxu1 }
 0x222   :  { %v462_v45 = vadd.f32 %v414_v43, %v375_v41  ;;  %v416_v46 = vpop.f32.mrb[5].mxu0  ;;  %v457_v47 = vpop.f32.mrb[5].mxu1  ;;  %v464_v56 = vadd.f32 %v455_v44, %v377_v55 }
 0x223   :  { %v463_v48 = vadd.f32 %v416_v46, %v376_v42  ;;  %v418_v49 = vpop.f32.mrb[6].mxu0  ;;  %v459_v50 = vpop.f32.mrb[6].mxu1  ;;  %v465_v58 = vadd.f32 %v457_v47, %v378_v57 }
 0x224   :  { %v1314_v51 = vmul.f32 -1.442695, %v462_v45  ;;  %v419_v52 = vpop.f32.mrb[7].mxu0  ;;  %v460_v53 = vpop.f32.mrb[7].mxu1  ;;  %v1316_v59 = vmul.f32 -1.442695, %v464_v56 }
 0x225   :  { %v1315_v54 = vmul.f32 -1.442695, %v463_v48  ;;  %v368_v43 = vpop.permute.xlu0 %367  ;;  %v501_v52 = vld [vmem:[#allocation5 + $0x48] sm:$0xff] }
 0x226   :  { %1416 = vpow2.f32 %v1314_v51  ;;  %v370_v48 = vmul.f32 %v368_v43, %v1835_v38  ;;  %v500_v38 = vld [vmem:[#allocation5 + $0x40] sm:$0xff] }
 0x227   :  { %1418 = vpow2.f32 %v1315_v54 }
 0x228   :  { %1420 = vtanh.f32 %v465_v58 }
 0x229   :  { %1422 = vpow2.f32 %v1316_v59  ;;  %v493_v46 = vpop.permute.xlu0 %492 }
 0x230   :  { %v1417_v60 = vpop.eup %1416 }
 0x231   :  { %v475_v61 = vadd.f32 1.0, %v1417_v60  ;;  %v1419_v62 = vpop.eup %1418 }
 0x232   :  { %v476_v63 = vadd.f32 1.0, %v1419_v62  ;;  %v1421_v25 = vpop.eup %1420 }
 0x233   :  { %1424 = vrcp.f32 %v475_v61  ;;  %v1423_v34 = vpop.eup %1422 }
 0x234   :  { %1426 = vrcp.f32 %v476_v63  ;;  %v477_v40 = vadd.f32 1.0, %v1423_v34  ;;  %v502_v34 = vld [vmem:[#allocation5 + $0x50] sm:$0xff] }
 0x236   :  { %1428 = vrcp.f32 %v477_v40 }
 0x23d   :  { %v1425_v36 = vpop.eup %1424 }
 0x23e   :  { %v486_v37 = vmul.f32 %v1425_v36, %v1421_v25  ;;  %v1427_v39 = vpop.eup %1426 }
 0x23f   :  { %v485_v41 = vmul.f32 %v1427_v39, %v1832_v35  ;;  %v1321_v35 = vld [vmem:[%s2092_s1 + $0x18] sm:$0xff] }
 0x240   :  { %v1429_v44 = vpop.eup %1428  ;;  %742 = vperm.xlu1 %1351, %v1321_v35  }
 0x241   :  { %v1877_v42 = vadd.f32 %v486_v37, %v485_v41  ;;  %v503_v37 = vld [vmem:[#allocation5 + $0x58] sm:$0xff] }
 0x243   :  { %1430 = vtanh.f32 %v1877_v42 }
 0x24d   :  { %v1431_v45 = vpop.eup %1430 }
 0x24e   :  { %v489_v47 = vmul.f32 %v1431_v45, %v1429_v44 }
 0x250   :  { %v495_v49 = vmul.f32 %v493_v46, %v489_v47  ;;  %v504_v50 = vpack.c.bf16 %v489_v47, %v489_v47 }
 0x252   :  { %v1881_v51 = vadd.f32 %v495_v49, %v370_v48  ;;  %538 = vmatmul.mubr.bf16.vlgmr.msra.gmra.mrb[8].mxu0 %v504_v50  ;;  %579 = vmatmul.mubr.bf16.vlgmr.msra.gmra.mrb[8].mxu1 %v504_v50 }
 0x253   :  { %631 = vmatpush1.bf16.msra.mxu0 %v1696_v2  ;;  %672 = vmatpush1.bf16.msra.mxu1 %v1709_v7 }
 0x254   :  { %632 = vmatprep.subr.bf16.mxu0 %v1699_v3  ;;  %673 = vmatprep.subr.bf16.mxu1 %v1719_v10 }
 0x255   :  { %662 = vmatprep.mubr.bf16.mxu0 %v1638_v0  ;;  %703 = vmatprep.mubr.bf16.mxu1 %v1638_v0 }
 0x257   :  { %633 = vmatpush1.bf16.msra.mxu0 %v1702_v4  ;;  %674 = vmatpush1.bf16.msra.mxu1 %v1721_v11 }
 0x258   :  { %634 = vmatprep.subr.bf16.mxu0 %v1705_v5  ;;  %675 = vmatprep.subr.bf16.mxu1 %v1729_v14 }
 0x25b   :  { %635 = vmatpush1.bf16.msra.mxu0 %v1712_v8  ;;  %676 = vmatpush1.bf16.msra.mxu1 %v1733_v15 }
 0x25c   :  { %636 = vmatprep.subr.bf16.mxu0 %v1716_v9  ;;  %677 = vmatprep.subr.bf16.mxu1 %v1736_v16 }
 0x25f   :  { %637 = vmatpush1.bf16.msra.mxu0 %v1725_v12  ;;  %678 = vmatpush1.bf16.msra.mxu1 %v1745_v19 }
 0x260   :  { %638 = vmatprep.subr.bf16.mxu0 %v1727_v13  ;;  %679 = vmatprep.subr.bf16.mxu1 %v1748_v20 }
 0x263   :  { %639 = vmatpush1.bf16.msra.mxu0 %v1739_v17  ;;  %680 = vmatpush1.bf16.msra.mxu1 %v1757_v23 }
 0x264   :  { %640 = vmatprep.subr.bf16.mxu0 %v1742_v18  ;;  %681 = vmatprep.subr.bf16.mxu1 %v1760_v24 }
 0x267   :  { %641 = vmatpush1.bf16.msra.mxu0 %v1751_v21  ;;  %682 = vmatpush1.bf16.msra.mxu1 %v1772_v28 }
 0x268   :  { %642 = vmatprep.subr.bf16.mxu0 %v1753_v22  ;;  %683 = vmatprep.subr.bf16.mxu1 %v1775_v29 }
 0x26b   :  { %643 = vmatpush1.bf16.msra.mxu0 %v1766_v26  ;;  %684 = vmatpush1.bf16.msra.mxu1 %v1782_v31 }
 0x26c   :  { %644 = vmatprep.subr.bf16.mxu0 %v1769_v27  ;;  %685 = vmatprep.subr.bf16.mxu1 %v1785_v32 }
 0x26f   :  { %645 = vmatpush1.bf16.msra.mxu0 %v1778_v30  ;;  %686 = vmatpush1.bf16.msra.mxu1 %v1789_v33 }
 0x270   :  { %755 = vmatprep.subr.bf16.mxu0 %v1694_v1  ;;  %796 = vmatprep.subr.bf16.mxu1 %v1707_v6 }
 0x325   :  { %v539_v53 = vpop.f32.mrb[8].mxu0  ;;  %v580_v54 = vpop.f32.mrb[8].mxu1 }
 0x326   :  { %v587_v55 = vadd.f32 %v539_v53, %v500_v38  ;;  %v541_v56 = vpop.f32.mrb[9].mxu0  ;;  %v582_v57 = vpop.f32.mrb[9].mxu1  ;;  %v589_v36 = vadd.f32 %v580_v54, %v502_v34 }
 0x327   :  { %v588_v58 = vadd.f32 %v541_v56, %v501_v52  ;;  %v543_v59 = vpop.f32.mrb[10].mxu0  ;;  %v584_v60 = vpop.f32.mrb[10].mxu1  ;;  %v590_v39 = vadd.f32 %v582_v57, %v503_v37 }
 0x328   :  { %v1318_v61 = vmul.f32 -1.442695, %v587_v55  ;;  %v544_v62 = vpop.f32.mrb[11].mxu0  ;;  %v585_v63 = vpop.f32.mrb[11].mxu1  ;;  %v1320_v40 = vmul.f32 -1.442695, %v589_v36 }
 0x329   :  { %v1319_v25 = vmul.f32 -1.442695, %v588_v58  ;;  %v618_v55 = vpop.permute.xlu1 %617  ;;  %v626_v60 = vld [vmem:[#allocation5 + $0x68] sm:$0xff] }
 0x32a   :  { %1432 = vpow2.f32 %v1318_v61 }
 0x32b   :  { %1434 = vpow2.f32 %v1319_v25 }
 0x32c   :  { %1436 = vtanh.f32 %v590_v39 }
 0x32d   :  { %1438 = vpow2.f32 %v1320_v40 }
 0x334   :  { %v1433_v41 = vpop.eup %1432 }
 0x335   :  { %v600_v43 = vadd.f32 1.0, %v1433_v41  ;;  %v1435_v44 = vpop.eup %1434 }
 0x336   :  { %v601_v45 = vadd.f32 1.0, %v1435_v44  ;;  %v1437_v46 = vpop.eup %1436 }
 0x337   :  { %1440 = vrcp.f32 %v600_v43  ;;  %v1439_v47 = vpop.eup %1438 }
 0x338   :  { %1442 = vrcp.f32 %v601_v45  ;;  %v602_v35 = vadd.f32 1.0, %v1439_v47  ;;  %v627_v45 = vld [vmem:[#allocation5 + $0x70] sm:$0xff]  ;;  %v628_v47 = vld [vmem:[#allocation5 + $0x78] sm:$0xff] }
 0x33a   :  { %1444 = vrcp.f32 %v602_v35 }
 0x341   :  { %v1441_v48 = vpop.eup %1440 }
 0x342   :  { %v611_v49 = vmul.f32 %v1441_v48, %v1437_v46  ;;  %v1443_v50 = vpop.eup %1442 }
 0x343   :  { %v610_v38 = vmul.f32 %v1443_v50, %v1877_v42  ;;  %v1325_v42 = vld [vmem:[%s2092_s1 + $0x20] sm:$0xff] }
 0x344   :  { %v1445_v53 = vpop.eup %1444  ;;  %867 = vperm.xlu0 %1350, %v1325_v42  }
 0x345   :  { %v1921_v52 = vadd.f32 %v611_v49, %v610_v38 }
 0x347   :  { %1446 = vtanh.f32 %v1921_v52 }
 0x351   :  { %v1447_v54 = vpop.eup %1446 }
 0x352   :  { %v614_v56 = vmul.f32 %v1447_v54, %v1445_v53 }
 0x354   :  { %v620_v57 = vmul.f32 %v618_v55, %v614_v56  ;;  %v629_v58 = vpack.c.bf16 %v614_v56, %v614_v56 }
 0x356   :  { %v1925_v59 = vadd.f32 %v620_v57, %v1881_v51  ;;  %663 = vmatmul.mubr.bf16.vlgmr.msra.gmra.mrb[12].mxu0 %v629_v58  ;;  %704 = vmatmul.mubr.bf16.vlgmr.msra.gmra.mrb[12].mxu1 %v629_v58  ;;  %v625_v51 = vld [vmem:[#allocation5 + $0x60] sm:$0xff] }
 0x357   :  { %756 = vmatpush1.bf16.msra.mxu0 %v1696_v2  ;;  %797 = vmatpush1.bf16.msra.mxu1 %v1709_v7 }
 0x358   :  { %757 = vmatprep.subr.bf16.mxu0 %v1699_v3  ;;  %798 = vmatprep.subr.bf16.mxu1 %v1719_v10 }
 0x359   :  { %787 = vmatprep.mubr.bf16.mxu0 %v1638_v0  ;;  %828 = vmatprep.mubr.bf16.mxu1 %v1638_v0 }
 0x35b   :  { %758 = vmatpush1.bf16.msra.mxu0 %v1702_v4  ;;  %799 = vmatpush1.bf16.msra.mxu1 %v1721_v11 }
 0x35c   :  { %759 = vmatprep.subr.bf16.mxu0 %v1705_v5  ;;  %800 = vmatprep.subr.bf16.mxu1 %v1729_v14 }
 0x35f   :  { %760 = vmatpush1.bf16.msra.mxu0 %v1712_v8  ;;  %801 = vmatpush1.bf16.msra.mxu1 %v1733_v15 }
 0x360   :  { %761 = vmatprep.subr.bf16.mxu0 %v1716_v9  ;;  %802 = vmatprep.subr.bf16.mxu1 %v1736_v16 }
 0x363   :  { %762 = vmatpush1.bf16.msra.mxu0 %v1725_v12  ;;  %803 = vmatpush1.bf16.msra.mxu1 %v1745_v19 }
 0x364   :  { %763 = vmatprep.subr.bf16.mxu0 %v1727_v13  ;;  %804 = vmatprep.subr.bf16.mxu1 %v1748_v20 }
 0x367   :  { %764 = vmatpush1.bf16.msra.mxu0 %v1739_v17  ;;  %805 = vmatpush1.bf16.msra.mxu1 %v1757_v23 }
 0x368   :  { %765 = vmatprep.subr.bf16.mxu0 %v1742_v18  ;;  %806 = vmatprep.subr.bf16.mxu1 %v1760_v24 }
 0x36b   :  { %766 = vmatpush1.bf16.msra.mxu0 %v1751_v21  ;;  %807 = vmatpush1.bf16.msra.mxu1 %v1772_v28 }
 0x36c   :  { %767 = vmatprep.subr.bf16.mxu0 %v1753_v22  ;;  %808 = vmatprep.subr.bf16.mxu1 %v1775_v29 }
 0x36f   :  { %768 = vmatpush1.bf16.msra.mxu0 %v1766_v26  ;;  %809 = vmatpush1.bf16.msra.mxu1 %v1782_v31 }
 0x370   :  { %769 = vmatprep.subr.bf16.mxu0 %v1769_v27  ;;  %810 = vmatprep.subr.bf16.mxu1 %v1785_v32 }
 0x373   :  { %770 = vmatpush1.bf16.msra.mxu0 %v1778_v30  ;;  %811 = vmatpush1.bf16.msra.mxu1 %v1789_v33 }
 0x374   :  { %880 = vmatprep.subr.bf16.mxu0 %v1694_v1  ;;  %921 = vmatprep.subr.bf16.mxu1 %v1707_v6 }
 0x429   :  { %v664_v61 = vpop.f32.mrb[12].mxu0  ;;  %v705_v62 = vpop.f32.mrb[12].mxu1 }
 0x42a   :  { %v712_v63 = vadd.f32 %v664_v61, %v625_v51  ;;  %v666_v25 = vpop.f32.mrb[13].mxu0  ;;  %v707_v34 = vpop.f32.mrb[13].mxu1  ;;  %v714_v46 = vadd.f32 %v705_v62, %v627_v45 }
 0x42b   :  { %v713_v36 = vadd.f32 %v666_v25, %v626_v60  ;;  %v668_v37 = vpop.f32.mrb[14].mxu0  ;;  %v709_v39 = vpop.f32.mrb[14].mxu1  ;;  %v715_v48 = vadd.f32 %v707_v34, %v628_v47 }
 0x42c   :  { %v1322_v40 = vmul.f32 -1.442695, %v712_v63  ;;  %v669_v41 = vpop.f32.mrb[15].mxu0  ;;  %v710_v43 = vpop.f32.mrb[15].mxu1  ;;  %v1324_v49 = vmul.f32 -1.442695, %v714_v46 }
 0x42d   :  { %v1323_v44 = vmul.f32 -1.442695, %v713_v36  ;;  %v743_v63 = vpop.permute.xlu1 %742 }
 0x42e   :  { %1448 = vpow2.f32 %v1322_v40 }
 0x42f   :  { %1450 = vpow2.f32 %v1323_v44 }
 0x430   :  { %1452 = vtanh.f32 %v715_v48 }
 0x431   :  { %1454 = vpow2.f32 %v1324_v49  ;;  %v753_v49 = vld [vmem:[#allocation5 + $0x98] sm:$0xff] }
 0x438   :  { %v1449_v50 = vpop.eup %1448 }
 0x439   :  { %v725_v35 = vadd.f32 1.0, %v1449_v50  ;;  %v1451_v38 = vpop.eup %1450 }
 0x43a   :  { %v726_v53 = vadd.f32 1.0, %v1451_v38  ;;  %v1453_v54 = vpop.eup %1452 }
 0x43b   :  { %1456 = vrcp.f32 %v725_v35  ;;  %v1455_v55 = vpop.eup %1454 }
 0x43c   :  { %1458 = vrcp.f32 %v726_v53  ;;  %v727_v42 = vadd.f32 1.0, %v1455_v55 }
 0x43e   :  { %1460 = vrcp.f32 %v727_v42 }
 0x445   :  { %v1457_v56 = vpop.eup %1456 }
 0x446   :  { %v736_v57 = vmul.f32 %v1457_v56, %v1453_v54  ;;  %v1459_v58 = vpop.eup %1458 }
 0x447   :  { %v735_v51 = vmul.f32 %v1459_v58, %v1921_v52 }
 0x448   :  { %v1461_v61 = vpop.eup %1460 }
 0x449   :  { %v1965_v60 = vadd.f32 %v736_v57, %v735_v51 }
 0x44b   :  { %1462 = vtanh.f32 %v1965_v60 }
 0x455   :  { %v1463_v62 = vpop.eup %1462 }
 0x456   :  { %v739_v25 = vmul.f32 %v1463_v62, %v1461_v61 }
 0x458   :  { %v745_v34 = vmul.f32 %v743_v63, %v739_v25  ;;  %v754_v36 = vpack.c.bf16 %v739_v25, %v739_v25 }
 0x45a   :  { %v1969_v37 = vadd.f32 %v745_v34, %v1925_v59  ;;  %788 = vmatmul.mubr.bf16.vlgmr.msra.gmra.mrb[16].mxu0 %v754_v36  ;;  %829 = vmatmul.mubr.bf16.vlgmr.msra.gmra.mrb[16].mxu1 %v754_v36  ;;  %v868_v36 = vpop.permute.xlu0 %867 }
 0x45b   :  { %881 = vmatpush1.bf16.msra.mxu0 %v1696_v2  ;;  %922 = vmatpush1.bf16.msra.mxu1 %v1709_v7  ;;  %v1329_v2 = vld [vmem:[%s2092_s1 + $0x28] sm:$0xff] }
 0x45c   :  { %882 = vmatprep.subr.bf16.mxu0 %v1699_v3  ;;  %923 = vmatprep.subr.bf16.mxu1 %v1719_v10  ;;  %v750_v3 = vld [vmem:[#allocation5 + $0x80] sm:$0xff] }
 0x45d   :  { %912 = vmatprep.mubr.bf16.mxu0 %v1638_v0  ;;  %953 = vmatprep.mubr.bf16.mxu1 %v1638_v0 }
 0x45e   :  { %992 = vperm.xlu1 %1351, %v1329_v2  }
 0x45f   :  { %883 = vmatpush1.bf16.msra.mxu0 %v1702_v4  ;;  %924 = vmatpush1.bf16.msra.mxu1 %v1721_v11  ;;  %v751_v4 = vld [vmem:[#allocation5 + $0x88] sm:$0xff] }
 0x460   :  { %884 = vmatprep.subr.bf16.mxu0 %v1705_v5  ;;  %925 = vmatprep.subr.bf16.mxu1 %v1729_v14 }
 0x463   :  { %885 = vmatpush1.bf16.msra.mxu0 %v1712_v8  ;;  %926 = vmatpush1.bf16.msra.mxu1 %v1733_v15 }
 0x464   :  { %886 = vmatprep.subr.bf16.mxu0 %v1716_v9  ;;  %927 = vmatprep.subr.bf16.mxu1 %v1736_v16 }
 0x467   :  { %887 = vmatpush1.bf16.msra.mxu0 %v1725_v12  ;;  %928 = vmatpush1.bf16.msra.mxu1 %v1745_v19 }
 0x468   :  { %888 = vmatprep.subr.bf16.mxu0 %v1727_v13  ;;  %929 = vmatprep.subr.bf16.mxu1 %v1748_v20 }
 0x46b   :  { %889 = vmatpush1.bf16.msra.mxu0 %v1739_v17  ;;  %930 = vmatpush1.bf16.msra.mxu1 %v1757_v23 }
 0x46c   :  { %890 = vmatprep.subr.bf16.mxu0 %v1742_v18  ;;  %931 = vmatprep.subr.bf16.mxu1 %v1760_v24 }
 0x46f   :  { %891 = vmatpush1.bf16.msra.mxu0 %v1751_v21  ;;  %932 = vmatpush1.bf16.msra.mxu1 %v1772_v28 }
 0x470   :  { %892 = vmatprep.subr.bf16.mxu0 %v1753_v22  ;;  %933 = vmatprep.subr.bf16.mxu1 %v1775_v29 }
 0x473   :  { %893 = vmatpush1.bf16.msra.mxu0 %v1766_v26  ;;  %934 = vmatpush1.bf16.msra.mxu1 %v1782_v31 }
 0x474   :  { %894 = vmatprep.subr.bf16.mxu0 %v1769_v27  ;;  %935 = vmatprep.subr.bf16.mxu1 %v1785_v32 }
 0x477   :  { %895 = vmatpush1.bf16.msra.mxu0 %v1778_v30  ;;  %936 = vmatpush1.bf16.msra.mxu1 %v1789_v33 }
 0x478   :  { %1005 = vmatprep.subr.bf16.mxu0 %v1694_v1  ;;  %1046 = vmatprep.subr.bf16.mxu1 %v1707_v6  ;;  %v752_v6 = vld [vmem:[#allocation5 + $0x90] sm:$0xff] }
 0x52d   :  { %v789_v5 = vpop.f32.mrb[16].mxu0  ;;  %v830_v52 = vpop.f32.mrb[16].mxu1 }
 0x52e   :  { %v837_v59 = vadd.f32 %v789_v5, %v750_v3  ;;  %v791_v39 = vpop.f32.mrb[17].mxu0  ;;  %v832_v40 = vpop.f32.mrb[17].mxu1  ;;  %v839_v48 = vadd.f32 %v830_v52, %v752_v6  ;;  %v2015_v52 = vld [vmem:[#allocation8] ss:$16 sps:$4 sm:$0xff]  }
 0x52f   :  { %v838_v41 = vadd.f32 %v791_v39, %v751_v4  ;;  %v793_v43 = vpop.f32.mrb[18].mxu0  ;;  %v834_v44 = vpop.f32.mrb[18].mxu1  ;;  %v840_v50 = vadd.f32 %v832_v40, %v753_v49 }
 0x530   :  { %v1326_v45 = vmul.f32 -1.442695, %v837_v59  ;;  %v794_v46 = vpop.f32.mrb[19].mxu0  ;;  %v835_v1 = vpop.f32.mrb[19].mxu1  ;;  %v1328_v35 = vmul.f32 -1.442695, %v839_v48 }
 0x531   :  { %v1327_v47 = vmul.f32 -1.442695, %v838_v41  ;;  %v2029_v59 = vld [vmem:[#allocation8 + $0x44] ss:$16 sps:$4 sm:$0xff]   ;;  %v993_v48 = vpop.permute.xlu1 %992 }
 0x532   :  { %1464 = vpow2.f32 %v1326_v45 }
 0x533   :  { %1466 = vpow2.f32 %v1327_v47 }
 0x534   :  { %1468 = vtanh.f32 %v840_v50 }
 0x535   :  { %1470 = vpow2.f32 %v1328_v35 }
 0x53c   :  { %v1465_v38 = vpop.eup %1464 }
 0x53d   :  { %v850_v53 = vadd.f32 1.0, %v1465_v38  ;;  %v1467_v54 = vpop.eup %1466 }
 0x53e   :  { %v851_v55 = vadd.f32 1.0, %v1467_v54  ;;  %v1469_v56 = vpop.eup %1468  ;;  %v1535_v54 = vld [vmem:[#allocation8 + $0x2c] ss:$16 sps:$4 sm:$0xff]  }
 0x53f   :  { %1472 = vrcp.f32 %v850_v53  ;;  %v1471_v57 = vpop.eup %1470  ;;  %v1534_v53 = vld [vmem:[#allocation8 + $0x8] ss:$16 sps:$4 sm:$0xff]  }
 0x540   :  { %1474 = vrcp.f32 %v851_v55  ;;  %v852_v61 = vadd.f32 1.0, %v1471_v57  ;;  %v1536_v55 = vld [vmem:[#allocation8 + $0x28] ss:$16 sps:$4 sm:$0xff]   ;;  %v1538_v57 = vld [vmem:[#allocation8 + $0x40] ss:$16 sps:$4 sm:$0xff]  }
 0x542   :  { %1476 = vrcp.f32 %v852_v61  ;;  %v1542_v61 = vld [vmem:[#allocation8 + $0x60] ss:$16 sps:$4 sm:$0xff]  }
 0x549   :  { %v1473_v58 = vpop.eup %1472 }
 0x54a   :  { %v861_v42 = vmul.f32 %v1473_v58, %v1469_v56  ;;  %v1475_v51 = vpop.eup %1474  ;;  %v1537_v56 = vld [vmem:[#allocation8 + $0x4c] ss:$16 sps:$4 sm:$0xff]   ;;  %v1539_v58 = vld [vmem:[#allocation8 + $0x48] ss:$16 sps:$4 sm:$0xff]  }
 0x54b   :  { %v860_v62 = vmul.f32 %v1475_v51, %v1965_v60  ;;  %v2019_v60 = vld [vmem:[#allocation8 + $0x24] ss:$16 sps:$4 sm:$0xff]   ;;  %v1541_v51 = vld [vmem:[#allocation8 + $0x6c] ss:$16 sps:$4 sm:$0xff]  }
 0x54c   :  { %v1477_v25 = vpop.eup %1476 }
 0x54d   :  { %v2009_v63 = vadd.f32 %v861_v42, %v860_v62  ;;  %v1540_v42 = vld [vmem:[#allocation8 + $0x64] ss:$16 sps:$4 sm:$0xff]   ;;  %v1543_v62 = vld [vmem:[#allocation8 + $0x68] ss:$16 sps:$4 sm:$0xff]  }
 0x54f   :  { %1478 = vtanh.f32 %v2009_v63 }
 0x559   :  { %v1479_v34 = vpop.eup %1478 }
 0x55a   :  { %v864_v2 = vmul.f32 %v1479_v34, %v1477_v25  ;;  %v1546_v25 = vld [vmem:[#allocation8 + $0x80] ss:$16 sps:$4 sm:$0xff]   ;;  %v1547_v34 = vld [vmem:[#allocation8 + $0x88] ss:$16 sps:$4 sm:$0xff]  }
 0x55c   :  { %v870_v3 = vmul.f32 %v868_v36, %v864_v2  ;;  %v879_v4 = vpack.c.bf16 %v864_v2, %v864_v2  ;;  %v1548_v36 = vld [vmem:[#allocation8 + $0xa4] ss:$16 sps:$4 sm:$0xff]   ;;  %v1549_v2 = vld [vmem:[#allocation8 + $0xac] ss:$16 sps:$4 sm:$0xff]  }
 0x55e   :  { %v2013_v5 = vadd.f32 %v870_v3, %v1969_v37  ;;  %913 = vmatmul.mubr.bf16.vlgmr.msra.gmra.mrb[20].mxu0 %v879_v4  ;;  %954 = vmatmul.mubr.bf16.vlgmr.msra.gmra.mrb[20].mxu1 %v879_v4  ;;  %v2025_v37 = vld [vmem:[#allocation8 + $0x20] ss:$16 sps:$4 sm:$0xff]   ;;  %v1551_v4 = vld [vmem:[#allocation8 + $0xa8] ss:$16 sps:$4 sm:$0xff]  }
 0x55f   :  { %1006 = vmatpush1.bf16.msra.mxu0 %v2015_v52  ;;  %1047 = vmatpush1.bf16.msra.mxu1 %v1709_v7  ;;  %v1532_v7 = vld [vmem:[#allocation8 + $0x4] ss:$16 sps:$4 sm:$0xff]   ;;  %v1550_v3 = vld [vmem:[#allocation8 + $0xa0] ss:$16 sps:$4 sm:$0xff]  }
 0x560   :  { %1007 = vmatprep.subr.bf16.mxu0 %v2019_v60  ;;  %1048 = vmatprep.subr.bf16.mxu1 %v1719_v10  ;;  %v875_v10 = vld [vmem:[#allocation5 + $0xa0] sm:$0xff] }
 0x561   :  { %1037 = vmatprep.mubr.bf16.mxu0 %v1638_v0  ;;  %1078 = vmatprep.mubr.bf16.mxu1 %v1638_v0 }
 0x563   :  { %1008 = vmatpush1.bf16.msra.mxu0 %v2025_v37  ;;  %1049 = vmatpush1.bf16.msra.mxu1 %v1721_v11  ;;  %v876_v11 = vld [vmem:[#allocation5 + $0xa8] sm:$0xff] }
 0x564   :  { %1009 = vmatprep.subr.bf16.mxu0 %v2029_v59  ;;  %1050 = vmatprep.subr.bf16.mxu1 %v1729_v14 }
 0x567   :  { %1010 = vmatpush1.bf16.msra.mxu0 %v1712_v8  ;;  %1051 = vmatpush1.bf16.msra.mxu1 %v1733_v15  ;;  %v1533_v8 = vld [vmem:[#allocation8 + $0xc] ss:$16 sps:$4 sm:$0xff]  }
 0x568   :  { %1011 = vmatprep.subr.bf16.mxu0 %v1716_v9  ;;  %1052 = vmatprep.subr.bf16.mxu1 %v1736_v16  ;;  %v1333_v9 = vld [vmem:[%s2092_s1 + $0x30] sm:$0xff] }
 0x569   :  { %1117 = vperm.xlu0 %1350, %v1333_v9   ;;  %v1559_v9 = vld [vmem:[#allocation8 + $0xe8] ss:$16 sps:$4 sm:$0xff]  }
 0x56b   :  { %1012 = vmatpush1.bf16.msra.mxu0 %v1725_v12  ;;  %1053 = vmatpush1.bf16.msra.mxu1 %v1745_v19 }
 0x56c   :  { %1013 = vmatprep.subr.bf16.mxu0 %v1727_v13  ;;  %1054 = vmatprep.subr.bf16.mxu1 %v1748_v20 }
 0x56f   :  { %1014 = vmatpush1.bf16.msra.mxu0 %v1739_v17  ;;  %1055 = vmatpush1.bf16.msra.mxu1 %v1757_v23 }
 0x570   :  { %1015 = vmatprep.subr.bf16.mxu0 %v1742_v18  ;;  %1056 = vmatprep.subr.bf16.mxu1 %v1760_v24  ;;  %v877_v24 = vld [vmem:[#allocation5 + $0xb0] sm:$0xff] }
 0x573   :  { %1016 = vmatpush1.bf16.msra.mxu0 %v1751_v21  ;;  %1057 = vmatpush1.bf16.msra.mxu1 %v1772_v28 }
 0x574   :  { %1017 = vmatprep.subr.bf16.mxu0 %v1753_v22  ;;  %1058 = vmatprep.subr.bf16.mxu1 %v1775_v29 }
 0x577   :  { %1018 = vmatpush1.bf16.msra.mxu0 %v1766_v26  ;;  %1059 = vmatpush1.bf16.msra.mxu1 %v1782_v31 }
 0x578   :  { %1019 = vmatprep.subr.bf16.mxu0 %v1769_v27  ;;  %1060 = vmatprep.subr.bf16.mxu1 %v1785_v32  ;;  %v878_v27 = vld [vmem:[#allocation5 + $0xb8] sm:$0xff] }
 0x57b   :  { %1020 = vmatpush1.bf16.msra.mxu0 %v1778_v30  ;;  %1061 = vmatpush1.bf16.msra.mxu1 %v1789_v33 }
 0x57c   :  { %1130 = vmatprep.subr.bf16.mxu0 %v1532_v7  ;;  %1171 = vmatprep.subr.bf16.mxu1 %v1533_v8  ;;  %v1557_v7 = vld [vmem:[#allocation8 + $0xec] ss:$16 sps:$4 sm:$0xff]   ;;  %v1558_v8 = vld [vmem:[#allocation8 + $0xe0] ss:$16 sps:$4 sm:$0xff]  }
 0x631   :  { %v914_v12 = vpop.f32.mrb[20].mxu0  ;;  %v955_v13 = vpop.f32.mrb[20].mxu1 }
 0x632   :  { %v962_v14 = vadd.f32 %v914_v12, %v875_v10  ;;  %v916_v15 = vpop.f32.mrb[21].mxu0  ;;  %v957_v16 = vpop.f32.mrb[21].mxu1  ;;  %v964_v26 = vadd.f32 %v955_v13, %v877_v24  ;;  %v1254_v10 = vld [vmem:[%s2094_s3] sm:$0xff]  ;;  %v1001_v13 = vld [vmem:[#allocation5 + $0xc8] sm:$0xff] }
 0x633   :  { %v963_v17 = vadd.f32 %v916_v15, %v876_v11  ;;  %v918_v18 = vpop.f32.mrb[22].mxu0  ;;  %v959_v19 = vpop.f32.mrb[22].mxu1  ;;  %v965_v28 = vadd.f32 %v957_v16, %v878_v27  ;;  %v1337_v11 = vld [vmem:[%s2092_s1 + $0x38] sm:$0xff]  ;;  %1257 = vperm.xlu0 %1350, %v1254_v10   ;;  %v1000_v12 = vld [vmem:[#allocation5 + $0xc0] sm:$0xff]  ;;  %v1002_v27 = vld [vmem:[#allocation5 + $0xd0] sm:$0xff]  ;;  %s1640_s1 = smov [#allocation10]  }
 0x634   :  { %v1330_v20 = vmul.f32 -1.442695, %v962_v14  ;;  %v919_v21 = vpop.f32.mrb[23].mxu0  ;;  %v960_v22 = vpop.f32.mrb[23].mxu1  ;;  %v1332_v29 = vmul.f32 -1.442695, %v964_v26  ;;  %1242 = vperm.xlu1 %1351, %v1337_v11  }
 0x635   :  { %v1331_v23 = vmul.f32 -1.442695, %v963_v17  ;;  %s1268_s3 = sshll.u32 %s1640_s1, 4  ;;  %s1269_s3 = int_to_ptr.vmem [resolvable:$true] %s1268_s3 }
 0x636   :  { %1480 = vpow2.f32 %v1330_v20  ;;  %s1604_s7 = scalar_lea.vmem %s1269_s3, 128  ;;  %p1609_p3 = scmp.lt.s32.totalorder %s1269_s3, %s1269_s3 }
 0x637   :  { %1482 = vpow2.f32 %v1331_v23  ;;  %p1605_p2 = scmp.ne.s32.totalorder %s1269_s3, %s1604_s7  ;;  %p1610_p4 = scmp.lt.s32.totalorder %s1604_s7, %s1604_s7 }
 0x638   :  { %1484 = vtanh.f32 %v965_v28 }
 0x639   :  { %1486 = vpow2.f32 %v1332_v29  ;;  %v1003_v29 = vld [vmem:[#allocation5 + $0xd8] sm:$0xff]  ;;  %p1611_p5 = por %p1610_p4, %p1609_p3 }
 0x63b   :  { %p1612_p6 = pnand %p1611_p5, %p1605_p2 }
 0x640   :  { %v1481_v30 = vpop.eup %1480 }
 0x641   :  { %v975_v31 = vadd.f32 1.0, %v1481_v30  ;;  %v1483_v32 = vpop.eup %1482 }
 0x642   :  { %v976_v33 = vadd.f32 1.0, %v1483_v32  ;;  %v1485_v39 = vpop.eup %1484 }
 0x643   :  { %1488 = vrcp.f32 %v975_v31  ;;  %v1487_v40 = vpop.eup %1486 }
 0x644   :  { %1490 = vrcp.f32 %v976_v33  ;;  %v977_v45 = vadd.f32 1.0, %v1487_v40 }
 0x646   :  { %1492 = vrcp.f32 %v977_v45 }
 0x64d   :  { %v1489_v41 = vpop.eup %1488 }
 0x64e   :  { %v986_v43 = vmul.f32 %v1489_v41, %v1485_v39  ;;  %v1491_v44 = vpop.eup %1490 }
 0x64f   :  { %v985_v46 = vmul.f32 %v1491_v44, %v2009_v63  ;;  %v1545_v63 = vld [vmem:[#allocation8 + $0x8c] ss:$16 sps:$4 sm:$0xff]  }
 0x650   :  { %v1493_v47 = vpop.eup %1492 }
 0x651   :  { %v2059_v1 = vadd.f32 %v986_v43, %v985_v46 }
 0x653   :  { %1494 = vtanh.f32 %v2059_v1 }
 0x65d   :  { %v1495_v6 = vpop.eup %1494 }
 0x65e   :  { %v989_v49 = vmul.f32 %v1495_v6, %v1493_v47 }
 0x660   :  { %v995_v50 = vmul.f32 %v993_v48, %v989_v49  ;;  %v1004_v35 = vpack.c.bf16 %v989_v49, %v989_v49 }
 0x662   :  { %v2063_v38 = vadd.f32 %v995_v50, %v2013_v5  ;;  %1038 = vmatmul.mubr.bf16.vlgmr.msra.gmra.mrb[24].mxu0 %v1004_v35  ;;  %1079 = vmatmul.mubr.bf16.vlgmr.msra.gmra.mrb[24].mxu1 %v1004_v35  ;;  %v1552_v5 = vld [vmem:[#allocation8 + $0xc4] ss:$16 sps:$4 sm:$0xff]   ;;  %v1118_v35 = vpop.permute.xlu0 %1117 }
 0x663   :  { %1131 = vmatpush1.bf16.msra.mxu0 %v2015_v52  ;;  %1172 = vmatpush1.bf16.msra.mxu1 %v1534_v53  ;;  %v1553_v52 = vld [vmem:[#allocation8 + $0xcc] ss:$16 sps:$4 sm:$0xff]  }
 0x664   :  { %1132 = vmatprep.subr.bf16.mxu0 %v2019_v60  ;;  %1173 = vmatprep.subr.bf16.mxu1 %v1535_v54  ;;  %v1554_v60 = vld [vmem:[#allocation8 + $0xc0] ss:$16 sps:$4 sm:$0xff]  }
 0x665   :  { %1162 = vmatprep.mubr.bf16.mxu0 %v1638_v0  ;;  %1203 = vmatprep.mubr.bf16.mxu1 %v1638_v0  ;;  %v1544_v0 = vld [vmem:[#allocation8 + $0x84] ss:$16 sps:$4 sm:$0xff]  }
 0x667   :  { %1133 = vmatpush1.bf16.msra.mxu0 %v2025_v37  ;;  %1174 = vmatpush1.bf16.msra.mxu1 %v1536_v55  ;;  %v1555_v37 = vld [vmem:[#allocation8 + $0xc8] ss:$16 sps:$4 sm:$0xff]  }
 0x668   :  { %1134 = vmatprep.subr.bf16.mxu0 %v2029_v59  ;;  %1175 = vmatprep.subr.bf16.mxu1 %v1537_v56  ;;  %v1556_v59 = vld [vmem:[#allocation8 + $0xe4] ss:$16 sps:$4 sm:$0xff]  }
 0x66b   :  { %1135 = vmatpush1.bf16.msra.mxu0 %v1538_v57  ;;  %1176 = vmatpush1.bf16.msra.mxu1 %v1539_v58  ;;  %v1125_v57 = vld [vmem:[#allocation5 + $0xe0] sm:$0xff]  ;;  %v1126_v58 = vld [vmem:[#allocation5 + $0xe8] sm:$0xff] }
 0x66c   :  { %1136 = vmatprep.subr.bf16.mxu0 %v1540_v42  ;;  %1177 = vmatprep.subr.bf16.mxu1 %v1541_v51 }
 0x66f   :  { %1137 = vmatpush1.bf16.msra.mxu0 %v1542_v61  ;;  %1178 = vmatpush1.bf16.msra.mxu1 %v1543_v62 }
 0x670   :  { %1138 = vmatprep.subr.bf16.mxu0 %v1544_v0  ;;  %1179 = vmatprep.subr.bf16.mxu1 %v1545_v63 }
 0x673   :  { %1139 = vmatpush1.bf16.msra.mxu0 %v1546_v25  ;;  %1180 = vmatpush1.bf16.msra.mxu1 %v1547_v34 }
 0x674   :  { %1140 = vmatprep.subr.bf16.mxu0 %v1548_v36  ;;  %1181 = vmatprep.subr.bf16.mxu1 %v1549_v2 }
 0x677   :  { %1141 = vmatpush1.bf16.msra.mxu0 %v1550_v3  ;;  %1182 = vmatpush1.bf16.msra.mxu1 %v1551_v4  ;;  %v1127_v4 = vld [vmem:[#allocation5 + $0xf0] sm:$0xff] }
 0x678   :  { %1142 = vmatprep.subr.bf16.mxu0 %v1552_v5  ;;  %1183 = vmatprep.subr.bf16.mxu1 %v1553_v52  ;;  %v1128_v5 = vld [vmem:[#allocation5 + $0xf8] sm:$0xff] }
 0x67b   :  { %1143 = vmatpush1.bf16.msra.mxu0 %v1554_v60  ;;  %1184 = vmatpush1.bf16.msra.mxu1 %v1555_v37 }
 0x67c   :  { %1144 = vmatprep.subr.bf16.mxu0 %v1556_v59  ;;  %1185 = vmatprep.subr.bf16.mxu1 %v1557_v7 }
 0x67f   :  { %1145 = vmatpush1.bf16.msra.mxu0 %v1558_v8  ;;  %1186 = vmatpush1.bf16.msra.mxu1 %v1559_v9 }
 0x735   :  { %v1039_v14 = vpop.f32.mrb[24].mxu0  ;;  %v1080_v15 = vpop.f32.mrb[24].mxu1 }
 0x736   :  { %v1087_v16 = vadd.f32 %v1039_v14, %v1000_v12  ;;  %v1041_v17 = vpop.f32.mrb[25].mxu0  ;;  %v1082_v18 = vpop.f32.mrb[25].mxu1  ;;  %v1089_v28 = vadd.f32 %v1080_v15, %v1002_v27 }
 0x737   :  { %v1088_v19 = vadd.f32 %v1041_v17, %v1001_v13  ;;  %v1043_v20 = vpop.f32.mrb[26].mxu0  ;;  %v1084_v21 = vpop.f32.mrb[26].mxu1  ;;  %v1090_v30 = vadd.f32 %v1082_v18, %v1003_v29 }
 0x738   :  { %v1334_v22 = vmul.f32 -1.442695, %v1087_v16  ;;  %v1044_v23 = vpop.f32.mrb[27].mxu0  ;;  %v1085_v24 = vpop.f32.mrb[27].mxu1  ;;  %v1336_v31 = vmul.f32 -1.442695, %v1089_v28 }
 0x739   :  { %v1335_v26 = vmul.f32 -1.442695, %v1088_v19  ;;  %v1243_v20 = vpop.permute.xlu1 %1242  ;;  %v1258_v23 = vpop.permute.xlu0 %1257 }
 0x73a   :  { %1496 = vpow2.f32 %v1334_v22 }
 0x73b   :  { %1498 = vpow2.f32 %v1335_v26 }
 0x73c   :  { %1500 = vtanh.f32 %v1090_v30 }
 0x73d   :  { %1502 = vpow2.f32 %v1336_v31 }
 0x744   :  { %v1497_v32 = vpop.eup %1496 }
 0x745   :  { %v1100_v33 = vadd.f32 1.0, %v1497_v32  ;;  %v1499_v39 = vpop.eup %1498 }
 0x746   :  { %v1101_v40 = vadd.f32 1.0, %v1499_v39  ;;  %v1501_v41 = vpop.eup %1500 }
 0x747   :  { %1504 = vrcp.f32 %v1100_v33  ;;  %v1503_v43 = vpop.eup %1502 }
 0x748   :  { %1506 = vrcp.f32 %v1101_v40  ;;  %v1102_v47 = vadd.f32 1.0, %v1503_v43 }
 0x74a   :  { %1508 = vrcp.f32 %v1102_v47 }
 0x751   :  { %v1505_v44 = vpop.eup %1504 }
 0x752   :  { %v1111_v45 = vmul.f32 %v1505_v44, %v1501_v41  ;;  %v1507_v46 = vpop.eup %1506 }
 0x753   :  { %v1110_v6 = vmul.f32 %v1507_v46, %v2059_v1 }
 0x754   :  { %v1509_v49 = vpop.eup %1508 }
 0x755   :  { %v1112_v48 = vadd.f32 %v1111_v45, %v1110_v6 }
 0x757   :  { %1510 = vtanh.f32 %v1112_v48 }
 0x761   :  { %v1511_v50 = vpop.eup %1510 }
 0x762   :  { %v1114_v53 = vmul.f32 %v1511_v50, %v1509_v49 }
 0x764   :  { %v1120_v54 = vmul.f32 %v1118_v35, %v1114_v53  ;;  %v1129_v55 = vpack.c.bf16 %v1114_v53, %v1114_v53 }
 0x766   :  { %v1121_v56 = vadd.f32 %v1120_v54, %v2063_v38  ;;  %1163 = vmatmul.mubr.bf16.vlgmr.msra.gmra.mrb[28].mxu0 %v1129_v55  ;;  %1204 = vmatmul.mubr.bf16.vlgmr.msra.gmra.mrb[28].mxu1 %v1129_v55 }
 0x839   :  { %v1164_v42 = vpop.f32.mrb[28].mxu0  ;;  %v1205_v51 = vpop.f32.mrb[28].mxu1 }
 0x83a   :  { %v1212_v61 = vadd.f32 %v1164_v42, %v1125_v57  ;;  %v1166_v62 = vpop.f32.mrb[29].mxu0  ;;  %v1207_v1 = vpop.f32.mrb[29].mxu1  ;;  %v1214_v38 = vadd.f32 %v1205_v51, %v1127_v4 }
 0x83b   :  { %v1213_v0 = vadd.f32 %v1166_v62, %v1126_v58  ;;  %v1168_v63 = vpop.f32.mrb[30].mxu0  ;;  %v1209_v25 = vpop.f32.mrb[30].mxu1  ;;  %v1215_v52 = vadd.f32 %v1207_v1, %v1128_v5 }
 0x83c   :  { %v1338_v34 = vmul.f32 -1.442695, %v1212_v61  ;;  %v1169_v36 = vpop.f32.mrb[31].mxu0  ;;  %v1210_v2 = vpop.f32.mrb[31].mxu1  ;;  %v1340_v60 = vmul.f32 -1.442695, %v1214_v38 }
 0x83d   :  { %v1339_v3 = vmul.f32 -1.442695, %v1213_v0 }
 0x83e   :  { %1512 = vpow2.f32 %v1338_v34 }
 0x83f   :  { %1514 = vpow2.f32 %v1339_v3 }
 0x840   :  { %1516 = vtanh.f32 %v1215_v52 }
 0x841   :  { %1518 = vpow2.f32 %v1340_v60 }
 0x848   :  { %v1513_v37 = vpop.eup %1512 }
 0x849   :  { %v1225_v59 = vadd.f32 1.0, %v1513_v37  ;;  %v1515_v7 = vpop.eup %1514 }
 0x84a   :  { %v1226_v8 = vadd.f32 1.0, %v1515_v7  ;;  %v1517_v9 = vpop.eup %1516 }
 0x84b   :  { %1520 = vrcp.f32 %v1225_v59  ;;  %v1519_v10 = vpop.eup %1518 }
 0x84c   :  { %1522 = vrcp.f32 %v1226_v8  ;;  %v1227_v14 = vadd.f32 1.0, %v1519_v10 }
 0x84e   :  { %1524 = vrcp.f32 %v1227_v14 }
 0x855   :  { %v1521_v11 = vpop.eup %1520 }
 0x856   :  { %v1236_v12 = vmul.f32 %v1521_v11, %v1517_v9  ;;  %v1523_v13 = vpop.eup %1522 }
 0x857   :  { %v1235_v15 = vmul.f32 %v1523_v13, %v1112_v48 }
 0x858   :  { %v1525_v17 = vpop.eup %1524 }
 0x859   :  { %v1237_v16 = vadd.f32 %v1236_v12, %v1235_v15 }
 0x85b   :  { %1526 = vtanh.f32 %v1237_v16 }
 0x865   :  { %v1527_v18 = vpop.eup %1526 }
 0x866   :  { %v1239_v19 = vmul.f32 %v1527_v18, %v1525_v17 }
 0x868   :  { %v1245_v21 = vmul.f32 %v1243_v20, %v1239_v19 }
 0x86a   :  { %v1246_v22 = vadd.f32 %v1245_v21, %v1121_v56 }
 0x86c   :  { %v1260_v24 = vmul.f32 %v1258_v23, %v1246_v22 }
 0x86e   :  { %1261 = vst [vmem:[#allocation10] sm:$0xff] %v1260_v24 }
 0x86f   :  { %1615 = shalt.err (!%p1612_p6)
}
 0x870   :  { %s1616_s10 = scalar_lea.hbm %s2095_s4, 128 }
 0x871   :  { %p1617_p7 = scmp.ne.s32.totalorder %s2095_s4, %s1616_s10  ;;  %p1620_p8 = scmp.lt.u32.totalorder %s1616_s10, %s2095_s4 }
 0x873   :  { %p1622_p9 = pnand %p1620_p8, %p1617_p7 }
 0x875   :  { %1625 = shalt.err (!%p1622_p9)
}
 0x876   :  { %1271 = dma.vmem_to_hbm [thread:$0]  %s1269_s3, 128, %s2095_s4, [#allocation7]  }
 0x877   :  { %1630 = dma.done.wait [#allocation7], 128  }
 0x878   :  { %1631 = vsyncadd [#allocation7], 4294967168 }
 0x879   :  { %1275 = vsyncpa [#allocation6], 1 }
 0x87a   :  { %1276 = vsyncpa [#allocation9], 1 }
 0x87b   :  { %1277 = vsyncpa [#allocation7], 1 }

</bundles_post_ra>
